<compile_context>
chip_gen: v7x
topology: tpu7x:2x2x1
jax: 0.10.0
libtpu: 0.0.40
codegen_flags: <defaults>
</compile_context>

<pallas_src>
import functools

import jax
import jax.numpy as jnp
import numpy as np
from jax.experimental import pallas as pl
from jax.experimental.pallas import tpu as pltpu


def _build_upsample_tap_matrix(H0, W0, Wp):
    """0/1 matrix P9 of shape (H0*W0, 9*Q):  x_flat @ P9 gives, for each of the
    nine 3x3 taps, the already-shifted im2col columns of the 2x nearest-
    upsampled + zero-padded plane in q = i*Wp + j flat layout."""
    H, W = 2 * H0, 2 * W0
    Q = H * Wp
    LPE = Q + 2 * Wp + 2
    ppad = np.zeros((H0 * W0, LPE), np.float32)
    for i in range(H):
        for j in range(W):
            ppad[(i // 2) * W0 + (j // 2), (i + 1) * Wp + (j + 1)] = 1.0
    offs = [dy * Wp + dx for dy in range(3) for dx in range(3)]
    return np.concatenate([ppad[:, d:d + Q] for d in offs], axis=1)


def _fused_block_kernel(nw_ref, x_ref, p9_ref, w1_ref, w2_ref, gb_ref, nz_ref,
                        mask_ref, o_ref, pad_ref, cols_ref, *,
                        N, Cin, H, W, Wp, Q, IB, eps):
    Cmid = w1_ref.shape[0]          # 2 * fmap_out
    half = Cmid // 2                # fmap_out
    offs = [dy * Wp + dx for dy in range(3) for dx in range(3)]
    valid = mask_ref[...]           # (1, N*Q) f32 {0,1} junk-column mask
    inv_cnt = 1.0 / float(N * H * W)

    def noise_bn_glu(y, stage):
        # y: (Cmid, N*Q) f32 conv output in batched q-layout.
        yn = y + nw_ref[stage] * nz_ref[stage]               # noise bcast over C
        ym = yn * valid
        # Single-pass BN stats (f32): var = E[y^2] - mean^2 over valid pixels.
        s1 = jnp.sum(ym, axis=1, keepdims=True)              # (Cmid, 1)
        s2 = jnp.sum(ym * ym, axis=1, keepdims=True)
        mean = s1 * inv_cnt
        var = s2 * inv_cnt - mean * mean
        scale = jax.lax.rsqrt(var + eps) * gb_ref[stage, 0]
        yh = (yn - mean) * scale + gb_ref[stage, 1]
        # GLU over channels (sublane split -> no lane crossing).
        return yh[:half, :] * jax.nn.sigmoid(yh[half:, :])   # (half, N*Q)

    # ---- stage 1: upsample + pad + tap shifts in ONE matmul, conv1 in ONE ----
    xpf9 = jnp.dot(x_ref[...], p9_ref[...],
                   preferred_element_type=jnp.float32)       # (N*Cin, 9*Q) f32
    for n in range(N):                                       # aligned slice copies
        for t in range(9):
            cols_ref[t * Cin:(t + 1) * Cin, n * Q:(n + 1) * Q] = (
                xpf9[n * Cin:(n + 1) * Cin, t * Q:(t + 1) * Q].astype(jnp.bfloat16))
    y1 = jnp.dot(w1_ref[...], cols_ref[0:9 * Cin, :],
                 preferred_element_type=jnp.float32)         # (Cmid, N*Q) f32
    g1 = noise_bn_glu(y1, 0)                                 # (half, N*Q) f32

    # ---- stage 2: halo-zero pad plane, aligned interior store, conv2 -------
    halo = jnp.zeros((N, half, Wp + 1), jnp.bfloat16)
    pad_ref[:, :, IB - Wp - 1:IB] = halo                     # leading halo only
    pad_ref[:, :, IB + Q:IB + Q + Wp + 1] = halo             # trailing halo only
    g1m = g1 * valid                                         # zero junk columns
    for n in range(N):
        pad_ref[n, :, IB:IB + Q] = g1m[:, n * Q:(n + 1) * Q].astype(jnp.bfloat16)
    for n in range(N):
        for t, d in enumerate(offs):                         # 9 shifted tap reads
            cols_ref[t * half:(t + 1) * half, n * Q:(n + 1) * Q] = (
                pad_ref[n, :, IB - Wp - 1 + d:IB - Wp - 1 + d + Q])
    y2 = jnp.dot(w2_ref[...], cols_ref[0:9 * half, :],
                 preferred_element_type=jnp.float32)         # (Cmid, N*Q) f32
    o_ref[...] = noise_bn_glu(y2, 1).astype(o_ref.dtype)     # (half, N*Q)


@jax.jit
def upsampling_comp_block(x, params, noise1, noise2):
    """x: (N, fmap_in, H0, W0) NCHW f32  ->  (N, fmap_out, 2*H0, 2*W0) f32."""
    N, Cin, H0, W0 = x.shape
    Cmid = params["w1"].shape[0]            # 2 * fmap_out
    half = Cmid // 2
    H, W = 2 * H0, 2 * W0

    # Width-padded flat layout with Q a multiple of 128 (lane-dense stores).
    Wp = W + 2
    while (H * Wp) % 128 != 0:
        Wp += 1
    Q = H * Wp
    NQ = N * Q
    IB = 128 * ((Wp + 1 + 127) // 128)      # interior of pad plane is 128-aligned
    PADL = 128 * ((IB + Q + Wp + 1 + 127) // 128)

    # ---- host-side packing (tiny, one-shot layout prep) ----
    xall = x.reshape(N * Cin, H0 * W0).astype(jnp.bfloat16)
    p9 = jnp.asarray(_build_upsample_tap_matrix(H0, W0, Wp), jnp.bfloat16)  # 0/1 exact
    w1 = jnp.transpose(params["w1"], (0, 2, 3, 1)).reshape(Cmid, 9 * Cin)
    w2 = jnp.transpose(params["w2"], (0, 2, 3, 1)).reshape(Cmid, 9 * half)
    w1 = w1.astype(jnp.bfloat16)
    w2 = w2.astype(jnp.bfloat16)
    gb = jnp.stack([jnp.stack([params["g1"], params["b1"]]),
                    jnp.stack([params["g2"], params["b2"]])])[..., None]  # (2,2,Cmid,1)
    nw = jnp.concatenate([params["nw1"], params["nw2"]])                  # (2,)

    def pack_noise(nz):                     # (N,1,H,W) -> (1, N*Q), zero junk cols
        return jnp.pad(nz, ((0, 0), (0, 0), (0, 0), (0, Wp - W))).reshape(1, NQ)

    nz = jnp.stack([pack_noise(noise1), pack_noise(noise2)])              # (2,1,NQ)
    mask = jnp.asarray(((np.arange(NQ) % Wp) < W).astype(np.float32)).reshape(1, NQ)

    rows = 9 * max(Cin, half)
    kern = functools.partial(_fused_block_kernel, N=N, Cin=Cin, H=H, W=W,
                             Wp=Wp, Q=Q, IB=IB, eps=1e-5)
    out_q = pl.pallas_call(
        kern,
        out_shape=jax.ShapeDtypeStruct((half, NQ), jnp.float32),
        grid=(1,),
        in_specs=[
            pl.BlockSpec(memory_space=pltpu.MemorySpace.SMEM),          # noise weights
            pl.BlockSpec((N * Cin, H0 * W0), lambda i: (0, 0)),         # x (flat, bf16)
            pl.BlockSpec((H0 * W0, 9 * Q), lambda i: (0, 0)),           # upsample+taps P9
            pl.BlockSpec((Cmid, 9 * Cin), lambda i: (0, 0)),            # conv1 weights
            pl.BlockSpec((Cmid, 9 * half), lambda i: (0, 0)),           # conv2 weights
            pl.BlockSpec((2, 2, Cmid, 1), lambda i: (0, 0, 0, 0)),      # gamma/beta
            pl.BlockSpec((2, 1, NQ), lambda i: (0, 0, 0)),              # noise maps
            pl.BlockSpec((1, NQ), lambda i: (0, 0)),                    # valid-col mask
        ],
        out_specs=pl.BlockSpec((half, NQ), lambda i: (0, 0)),
        scratch_shapes=[
            pltpu.VMEM((N, half, PADL), jnp.bfloat16),   # conv2 zero-padded plane
            pltpu.VMEM((rows, NQ), jnp.bfloat16),        # im2col staging (bf16)
        ],
        compiler_params=pltpu.CompilerParams(dimension_semantics=("arbitrary",)),
    )(nw, xall, p9, w1, w2, gb, nz, mask)

    # Epilogue: q-layout -> NCHW (drop junk columns).  Kept outside the kernel so
    # the kernel's output store stays a dense, 128-aligned lane slab.
    out = out_q.reshape(half, N, H, Wp)[:, :, :, :W]
    return jnp.transpose(out, (1, 0, 2, 3))


# ---------------------------------------------------------------------------
# Pure-JAX NCHW reference (mirrors the PyTorch module; bf16 matmul operands +
# f32 accumulation, exactly like the kernel's MXU precision).
# ---------------------------------------------------------------------------
def _ref_conv(x, w):
    return jax.lax.conv_general_dilated(
        x.astype(jnp.bfloat16), w.astype(jnp.bfloat16),
        window_strides=(1, 1), padding=((1, 1), (1, 1)),
        dimension_numbers=("NCHW", "OIHW", "NCHW"),
        preferred_element_type=jnp.float32)


def _ref_noise_bn_glu(x, noise, nw, g, b, eps=1e-5):
    y = x + nw[0] * noise
    mean = y.mean(axis=(0, 2, 3), keepdims=True)
    var = ((y - mean) ** 2).mean(axis=(0, 2, 3), keepdims=True)
    yh = (y - mean) * jax.lax.rsqrt(var + eps) * g.reshape(1, -1, 1, 1) \
        + b.reshape(1, -1, 1, 1)
    half = yh.shape[1] // 2
    return yh[:, :half] * jax.nn.sigmoid(yh[:, half:])


def _ref_block(x, params, noise1, noise2):
    x = jnp.repeat(jnp.repeat(x, 2, axis=2), 2, axis=3)      # nearest 2x upsample
    x = _ref_conv(x, params["w1"])
    x = _ref_noise_bn_glu(x, noise1, params["nw1"], params["g1"], params["b1"])
    x = _ref_conv(x, params["w2"])
    x = _ref_noise_bn_glu(x, noise2, params["nw2"], params["g2"], params["b2"])
    return x


if __name__ == "__main__":
    # batch=2, fmap_in=4, fmap_out=4, input spatial 8x8 (upsampled to 16x16).
    N, fmap_in, fmap_out, H0, W0 = 2, 4, 4, 8, 8
    key = jax.random.PRNGKey(0)
    ks = jax.random.split(key, 9)

    x = jax.random.normal(ks[0], (N, fmap_in, H0, W0), jnp.float32)
    params = {
        # Conv2d(fmap_in, 2*fmap_out, 3, padding=1, bias=False) -> OIHW
        "w1": 0.1 * jax.random.normal(ks[1], (2 * fmap_out, fmap_in, 3, 3), jnp.float32),
        # Conv2d(fmap_out, 2*fmap_out, 3, padding=1, bias=False)
        "w2": 0.1 * jax.random.normal(ks[2], (2 * fmap_out, fmap_out, 3, 3), jnp.float32),
        # BatchNorm2d affine params (non-default so the affine path is exercised)
        "g1": 1.0 + 0.1 * jax.random.normal(ks[3], (2 * fmap_out,), jnp.float32),
        "b1": 0.1 * jax.random.normal(ks[4], (2 * fmap_out,), jnp.float32),
        "g2": 1.0 + 0.1 * jax.random.normal(ks[5], (2 * fmap_out,), jnp.float32),
        "b2": 0.1 * jax.random.normal(ks[6], (2 * fmap_out,), jnp.float32),
        # NoiseInjection weights (nonzero so the noise path is exercised)
        "nw1": jnp.array([0.3], jnp.float32),
        "nw2": jnp.array([-0.2], jnp.float32),
    }
    # NoiseInjection draws randn(b, 1, h, w) when noise is None; passed
    # explicitly here (deterministic) so the reference check is meaningful.
    noise1 = jax.random.normal(ks[7], (N, 1, 2 * H0, 2 * W0), jnp.float32)
    noise2 = jax.random.normal(ks[8], (N, 1, 2 * H0, 2 * W0), jnp.float32)

    out = jax.block_until_ready(upsampling_comp_block(x, params, noise1, noise2))
    ref = jax.block_until_ready(_ref_block(x, params, noise1, noise2))

    assert out.shape == (N, fmap_out, 2 * H0, 2 * W0), out.shape
    err = jnp.abs(out - ref)
    # bf16 matmul operands: kernel and reference may round a handful of conv-2
    # inputs to different bf16 neighbours; tolerance covers it.
    assert float(jnp.max(err)) < 1e-2, float(jnp.max(err))
    assert float(jnp.mean(err)) < 1e-3, float(jnp.mean(err))
    print("KERNEL_OK")
</pallas_src>

<mosaic_0001>
module attributes {stable_mosaic.version = 11 : i64} {
  func.func @_fused_block_kernel(%arg0: i32, %arg1: memref<2xf32, #tpu.memory_space<smem>>, %arg2: memref<8x64xbf16, #tpu.memory_space<vmem>>, %arg3: memref<64x3456xbf16, #tpu.memory_space<vmem>>, %arg4: memref<8x36xbf16, #tpu.memory_space<vmem>>, %arg5: memref<8x36xbf16, #tpu.memory_space<vmem>>, %arg6: memref<2x2x8x1xf32, #tpu.memory_space<vmem>>, %arg7: memref<2x1x768xf32, #tpu.memory_space<vmem>>, %arg8: memref<1x768xf32, #tpu.memory_space<vmem>>, %arg9: memref<4x768xf32, #tpu.memory_space<vmem>>, %arg10: memref<2x4x640xbf16, #tpu.memory_space<vmem>>, %arg11: memref<36x768xbf16, #tpu.memory_space<vmem>>) attributes {dimension_semantics = [#tpu.dimension_semantics<arbitrary>], iteration_bounds = array<i64: 1>, scalar_prefetch = 0 : i64, scratch_operands = 2 : i64, tpu.core_type = #tpu.core_type<tc>, window_params = [{transform_indices = @transform_0, window_bounds = array<i64: 2>}, {pipeline_mode = #tpu.pipeline_mode<synchronous>, transform_indices = @transform_1, window_bounds = array<i64: 8, 64>}, {pipeline_mode = #tpu.pipeline_mode<synchronous>, transform_indices = @transform_2, window_bounds = array<i64: 64, 3456>}, {pipeline_mode = #tpu.pipeline_mode<synchronous>, transform_indices = @transform_3, window_bounds = array<i64: 8, 36>}, {pipeline_mode = #tpu.pipeline_mode<synchronous>, transform_indices = @transform_4, window_bounds = array<i64: 8, 36>}, {pipeline_mode = #tpu.pipeline_mode<synchronous>, transform_indices = @transform_5, window_bounds = array<i64: 2, 2, 8, 1>}, {pipeline_mode = #tpu.pipeline_mode<synchronous>, transform_indices = @transform_6, window_bounds = array<i64: 2, 1, 768>}, {pipeline_mode = #tpu.pipeline_mode<synchronous>, transform_indices = @transform_7, window_bounds = array<i64: 1, 768>}, {pipeline_mode = #tpu.pipeline_mode<synchronous>, transform_indices = @transform_8, window_bounds = array<i64: 4, 768>}]} {
    %c0 = arith.constant 0 : index
    %c0_0 = arith.constant 0 : index
    %0 = vector.load %arg8[%c0, %c0_0] : memref<1x768xf32, #tpu.memory_space<vmem>>, vector<1x768xf32>
    %c0_1 = arith.constant 0 : index
    %c0_2 = arith.constant 0 : index
    %1 = vector.load %arg2[%c0_1, %c0_2] : memref<8x64xbf16, #tpu.memory_space<vmem>>, vector<8x64xbf16>
    %c0_3 = arith.constant 0 : index
    %c0_4 = arith.constant 0 : index
    %2 = vector.load %arg3[%c0_3, %c0_4] : memref<64x3456xbf16, #tpu.memory_space<vmem>>, vector<64x3456xbf16>
    %cst = arith.constant dense<0.000000e+00> : vector<8x3456xf32>
    %3 = tpu.matmul %1, %2, %cst {dimension_numbers = #tpu.dot_dimension_numbers<[1], [0], [0], [1], [0, 0, 1, 1], [], []>} : vector<8x64xbf16>, vector<64x3456xbf16>, vector<8x3456xf32> -> vector<8x3456xf32>
    %4 = vector.extract_strided_slice %3 {offsets = [0, 0], sizes = [4, 384], strides = [1, 1]} : vector<8x3456xf32> to vector<4x384xf32>
    %5 = arith.truncf %4 : vector<4x384xf32> to vector<4x384xbf16>
    %c0_5 = arith.constant 0 : index
    %c0_6 = arith.constant 0 : index
    %6 = vector.load %arg11[%c0_5, %c0_6] : memref<36x768xbf16, #tpu.memory_space<vmem>>, vector<4x384xbf16>
    tpu.vector_store %arg11[%c0_5, %c0_6], %5 {strides = array<i32>} : memref<36x768xbf16, #tpu.memory_space<vmem>>, vector<4x384xbf16>,
    %7 = vector.extract_strided_slice %3 {offsets = [0, 384], sizes = [4, 384], strides = [1, 1]} : vector<8x3456xf32> to vector<4x384xf32>
    %8 = arith.truncf %7 : vector<4x384xf32> to vector<4x384xbf16>
    %c4 = arith.constant 4 : index
    %c0_7 = arith.constant 0 : index
    %9 = vector.load %arg11[%c4, %c0_7] : memref<36x768xbf16, #tpu.memory_space<vmem>>, vector<4x384xbf16>
    tpu.vector_store %arg11[%c4, %c0_7], %8 {strides = array<i32>} : memref<36x768xbf16, #tpu.memory_space<vmem>>, vector<4x384xbf16>,
    %10 = vector.extract_strided_slice %3 {offsets = [0, 768], sizes = [4, 384], strides = [1, 1]} : vector<8x3456xf32> to vector<4x384xf32>
    %11 = arith.truncf %10 : vector<4x384xf32> to vector<4x384xbf16>
    %c8 = arith.constant 8 : index
    %c0_8 = arith.constant 0 : index
    %12 = vector.load %arg11[%c8, %c0_8] : memref<36x768xbf16, #tpu.memory_space<vmem>>, vector<4x384xbf16>
    tpu.vector_store %arg11[%c8, %c0_8], %11 {strides = array<i32>} : memref<36x768xbf16, #tpu.memory_space<vmem>>, vector<4x384xbf16>,
    %13 = vector.extract_strided_slice %3 {offsets = [0, 1152], sizes = [4, 384], strides = [1, 1]} : vector<8x3456xf32> to vector<4x384xf32>
    %14 = arith.truncf %13 : vector<4x384xf32> to vector<4x384xbf16>
    %c12 = arith.constant 12 : index
    %c0_9 = arith.constant 0 : index
    %15 = vector.load %arg11[%c12, %c0_9] : memref<36x768xbf16, #tpu.memory_space<vmem>>, vector<4x384xbf16>
    tpu.vector_store %arg11[%c12, %c0_9], %14 {strides = array<i32>} : memref<36x768xbf16, #tpu.memory_space<vmem>>, vector<4x384xbf16>,
    %16 = vector.extract_strided_slice %3 {offsets = [0, 1536], sizes = [4, 384], strides = [1, 1]} : vector<8x3456xf32> to vector<4x384xf32>
    %17 = arith.truncf %16 : vector<4x384xf32> to vector<4x384xbf16>
    %c16 = arith.constant 16 : index
    %c0_10 = arith.constant 0 : index
    %18 = vector.load %arg11[%c16, %c0_10] : memref<36x768xbf16, #tpu.memory_space<vmem>>, vector<4x384xbf16>
    tpu.vector_store %arg11[%c16, %c0_10], %17 {strides = array<i32>} : memref<36x768xbf16, #tpu.memory_space<vmem>>, vector<4x384xbf16>,
    %19 = vector.extract_strided_slice %3 {offsets = [0, 1920], sizes = [4, 384], strides = [1, 1]} : vector<8x3456xf32> to vector<4x384xf32>
    %20 = arith.truncf %19 : vector<4x384xf32> to vector<4x384xbf16>
    %c20 = arith.constant 20 : index
    %c0_11 = arith.constant 0 : index
    %21 = vector.load %arg11[%c20, %c0_11] : memref<36x768xbf16, #tpu.memory_space<vmem>>, vector<4x384xbf16>
    tpu.vector_store %arg11[%c20, %c0_11], %20 {strides = array<i32>} : memref<36x768xbf16, #tpu.memory_space<vmem>>, vector<4x384xbf16>,
    %22 = vector.extract_strided_slice %3 {offsets = [0, 2304], sizes = [4, 384], strides = [1, 1]} : vector<8x3456xf32> to vector<4x384xf32>
    %23 = arith.truncf %22 : vector<4x384xf32> to vector<4x384xbf16>
    %c24 = arith.constant 24 : index
    %c0_12 = arith.constant 0 : index
    %24 = vector.load %arg11[%c24, %c0_12] : memref<36x768xbf16, #tpu.memory_space<vmem>>, vector<4x384xbf16>
    tpu.vector_store %arg11[%c24, %c0_12], %23 {strides = array<i32>} : memref<36x768xbf16, #tpu.memory_space<vmem>>, vector<4x384xbf16>,
    %25 = vector.extract_strided_slice %3 {offsets = [0, 2688], sizes = [4, 384], strides = [1, 1]} : vector<8x3456xf32> to vector<4x384xf32>
    %26 = arith.truncf %25 : vector<4x384xf32> to vector<4x384xbf16>
    %c28 = arith.constant 28 : index
    %c0_13 = arith.constant 0 : index
    %27 = vector.load %arg11[%c28, %c0_13] : memref<36x768xbf16, #tpu.memory_space<vmem>>, vector<4x384xbf16>
    tpu.vector_store %arg11[%c28, %c0_13], %26 {strides = array<i32>} : memref<36x768xbf16, #tpu.memory_space<vmem>>, vector<4x384xbf16>,
    %28 = vector.extract_strided_slice %3 {offsets = [0, 3072], sizes = [4, 384], strides = [1, 1]} : vector<8x3456xf32> to vector<4x384xf32>
    %29 = arith.truncf %28 : vector<4x384xf32> to vector<4x384xbf16>
    %c32 = arith.constant 32 : index
    %c0_14 = arith.constant 0 : index
    %30 = vector.load %arg11[%c32, %c0_14] : memref<36x768xbf16, #tpu.memory_space<vmem>>, vector<4x384xbf16>
    tpu.vector_store %arg11[%c32, %c0_14], %29 {strides = array<i32>} : memref<36x768xbf16, #tpu.memory_space<vmem>>, vector<4x384xbf16>,
    %31 = vector.extract_strided_slice %3 {offsets = [4, 0], sizes = [4, 384], strides = [1, 1]} : vector<8x3456xf32> to vector<4x384xf32>
    %32 = arith.truncf %31 : vector<4x384xf32> to vector<4x384xbf16>
    %c0_15 = arith.constant 0 : index
    %c384 = arith.constant 384 : index
    %33 = vector.load %arg11[%c0_15, %c384] : memref<36x768xbf16, #tpu.memory_space<vmem>>, vector<4x384xbf16>
    tpu.vector_store %arg11[%c0_15, %c384], %32 {strides = array<i32>} : memref<36x768xbf16, #tpu.memory_space<vmem>>, vector<4x384xbf16>,
    %34 = vector.extract_strided_slice %3 {offsets = [4, 384], sizes = [4, 384], strides = [1, 1]} : vector<8x3456xf32> to vector<4x384xf32>
    %35 = arith.truncf %34 : vector<4x384xf32> to vector<4x384xbf16>
    %c4_16 = arith.constant 4 : index
    %c384_17 = arith.constant 384 : index
    %36 = vector.load %arg11[%c4_16, %c384_17] : memref<36x768xbf16, #tpu.memory_space<vmem>>, vector<4x384xbf16>
    tpu.vector_store %arg11[%c4_16, %c384_17], %35 {strides = array<i32>} : memref<36x768xbf16, #tpu.memory_space<vmem>>, vector<4x384xbf16>,
    %37 = vector.extract_strided_slice %3 {offsets = [4, 768], sizes = [4, 384], strides = [1, 1]} : vector<8x3456xf32> to vector<4x384xf32>
    %38 = arith.truncf %37 : vector<4x384xf32> to vector<4x384xbf16>
    %c8_18 = arith.constant 8 : index
    %c384_19 = arith.constant 384 : index
    %39 = vector.load %arg11[%c8_18, %c384_19] : memref<36x768xbf16, #tpu.memory_space<vmem>>, vector<4x384xbf16>
    tpu.vector_store %arg11[%c8_18, %c384_19], %38 {strides = array<i32>} : memref<36x768xbf16, #tpu.memory_space<vmem>>, vector<4x384xbf16>,
    %40 = vector.extract_strided_slice %3 {offsets = [4, 1152], sizes = [4, 384], strides = [1, 1]} : vector<8x3456xf32> to vector<4x384xf32>
    %41 = arith.truncf %40 : vector<4x384xf32> to vector<4x384xbf16>
    %c12_20 = arith.constant 12 : index
    %c384_21 = arith.constant 384 : index
    %42 = vector.load %arg11[%c12_20, %c384_21] : memref<36x768xbf16, #tpu.memory_space<vmem>>, vector<4x384xbf16>
    tpu.vector_store %arg11[%c12_20, %c384_21], %41 {strides = array<i32>} : memref<36x768xbf16, #tpu.memory_space<vmem>>, vector<4x384xbf16>,
    %43 = vector.extract_strided_slice %3 {offsets = [4, 1536], sizes = [4, 384], strides = [1, 1]} : vector<8x3456xf32> to vector<4x384xf32>
    %44 = arith.truncf %43 : vector<4x384xf32> to vector<4x384xbf16>
    %c16_22 = arith.constant 16 : index
    %c384_23 = arith.constant 384 : index
    %45 = vector.load %arg11[%c16_22, %c384_23] : memref<36x768xbf16, #tpu.memory_space<vmem>>, vector<4x384xbf16>
    tpu.vector_store %arg11[%c16_22, %c384_23], %44 {strides = array<i32>} : memref<36x768xbf16, #tpu.memory_space<vmem>>, vector<4x384xbf16>,
    %46 = vector.extract_strided_slice %3 {offsets = [4, 1920], sizes = [4, 384], strides = [1, 1]} : vector<8x3456xf32> to vector<4x384xf32>
    %47 = arith.truncf %46 : vector<4x384xf32> to vector<4x384xbf16>
    %c20_24 = arith.constant 20 : index
    %c384_25 = arith.constant 384 : index
    %48 = vector.load %arg11[%c20_24, %c384_25] : memref<36x768xbf16, #tpu.memory_space<vmem>>, vector<4x384xbf16>
    tpu.vector_store %arg11[%c20_24, %c384_25], %47 {strides = array<i32>} : memref<36x768xbf16, #tpu.memory_space<vmem>>, vector<4x384xbf16>,
    %49 = vector.extract_strided_slice %3 {offsets = [4, 2304], sizes = [4, 384], strides = [1, 1]} : vector<8x3456xf32> to vector<4x384xf32>
    %50 = arith.truncf %49 : vector<4x384xf32> to vector<4x384xbf16>
    %c24_26 = arith.constant 24 : index
    %c384_27 = arith.constant 384 : index
    %51 = vector.load %arg11[%c24_26, %c384_27] : memref<36x768xbf16, #tpu.memory_space<vmem>>, vector<4x384xbf16>
    tpu.vector_store %arg11[%c24_26, %c384_27], %50 {strides = array<i32>} : memref<36x768xbf16, #tpu.memory_space<vmem>>, vector<4x384xbf16>,
    %52 = vector.extract_strided_slice %3 {offsets = [4, 2688], sizes = [4, 384], strides = [1, 1]} : vector<8x3456xf32> to vector<4x384xf32>
    %53 = arith.truncf %52 : vector<4x384xf32> to vector<4x384xbf16>
    %c28_28 = arith.constant 28 : index
    %c384_29 = arith.constant 384 : index
    %54 = vector.load %arg11[%c28_28, %c384_29] : memref<36x768xbf16, #tpu.memory_space<vmem>>, vector<4x384xbf16>
    tpu.vector_store %arg11[%c28_28, %c384_29], %53 {strides = array<i32>} : memref<36x768xbf16, #tpu.memory_space<vmem>>, vector<4x384xbf16>,
    %55 = vector.extract_strided_slice %3 {offsets = [4, 3072], sizes = [4, 384], strides = [1, 1]} : vector<8x3456xf32> to vector<4x384xf32>
    %56 = arith.truncf %55 : vector<4x384xf32> to vector<4x384xbf16>
    %c32_30 = arith.constant 32 : index
    %c384_31 = arith.constant 384 : index
    %57 = vector.load %arg11[%c32_30, %c384_31] : memref<36x768xbf16, #tpu.memory_space<vmem>>, vector<4x384xbf16>
    tpu.vector_store %arg11[%c32_30, %c384_31], %56 {strides = array<i32>} : memref<36x768xbf16, #tpu.memory_space<vmem>>, vector<4x384xbf16>,
    %c0_32 = arith.constant 0 : index
    %c0_33 = arith.constant 0 : index
    %58 = vector.load %arg4[%c0_32, %c0_33] : memref<8x36xbf16, #tpu.memory_space<vmem>>, vector<8x36xbf16>
    %c0_34 = arith.constant 0 : index
    %c0_35 = arith.constant 0 : index
    %59 = vector.load %arg11[%c0_34, %c0_35] : memref<36x768xbf16, #tpu.memory_space<vmem>>, vector<36x768xbf16>
    %cst_36 = arith.constant dense<0.000000e+00> : vector<8x768xf32>
    %60 = tpu.matmul %58, %59, %cst_36 {dimension_numbers = #tpu.dot_dimension_numbers<[1], [0], [0], [1], [0, 0, 1, 1], [], []>} : vector<8x36xbf16>, vector<36x768xbf16>, vector<8x768xf32> -> vector<8x768xf32>
    %c0_37 = arith.constant 0 : index
    %61 = memref.load %arg1[%c0_37] : memref<2xf32, #tpu.memory_space<smem>>
    %c0_38 = arith.constant 0 : index
    %c0_39 = arith.constant 0 : index
    %c0_40 = arith.constant 0 : index
    %62 = vector.load %arg7[%c0_38, %c0_39, %c0_40] : memref<2x1x768xf32, #tpu.memory_space<vmem>>, vector<1x1x768xf32>
    %63 = vector.shape_cast %62 : vector<1x1x768xf32> to vector<1x768xf32>
    %64 = vector.broadcast %61 : f32 to vector<1x768xf32>
    %65 = arith.mulf %64, %63 : vector<1x768xf32>
    %66 = vector.broadcast %65 : vector<1x768xf32> to vector<8x768xf32>
    %67 = arith.addf %60, %66 : vector<8x768xf32>
    %68 = vector.broadcast %0 : vector<1x768xf32> to vector<8x768xf32>
    %69 = arith.mulf %67, %68 : vector<8x768xf32>
    %cst_41 = arith.constant dense<0.000000e+00> : vector<8xf32>
    %70 = vector.multi_reduction <add>, %69, %cst_41 [1] : vector<8x768xf32> to vector<8xf32>
    %71 = vector.shape_cast %70 : vector<8xf32> to vector<8x1xf32>
    %72 = arith.mulf %69, %69 : vector<8x768xf32>
    %cst_42 = arith.constant dense<0.000000e+00> : vector<8xf32>
    %73 = vector.multi_reduction <add>, %72, %cst_42 [1] : vector<8x768xf32> to vector<8xf32>
    %74 = vector.shape_cast %73 : vector<8xf32> to vector<8x1xf32>
    %cst_43 = arith.constant 0.001953125 : f32
    %75 = vector.broadcast %cst_43 : f32 to vector<8x1xf32>
    %76 = arith.mulf %71, %75 : vector<8x1xf32>
    %cst_44 = arith.constant 0.001953125 : f32
    %77 = vector.broadcast %cst_44 : f32 to vector<8x1xf32>
    %78 = arith.mulf %74, %77 : vector<8x1xf32>
    %79 = arith.mulf %76, %76 : vector<8x1xf32>
    %80 = arith.subf %78, %79 : vector<8x1xf32>
    %cst_45 = arith.constant 9.99999974E-6 : f32
    %81 = vector.broadcast %cst_45 : f32 to vector<8x1xf32>
    %82 = arith.addf %80, %81 : vector<8x1xf32>
    %83 = math.rsqrt %82 : vector<8x1xf32>
    %c0_46 = arith.constant 0 : index
    %c0_47 = arith.constant 0 : index
    %c0_48 = arith.constant 0 : index
    %c0_49 = arith.constant 0 : index
    %84 = vector.load %arg6[%c0_46, %c0_47, %c0_48, %c0_49] : memref<2x2x8x1xf32, #tpu.memory_space<vmem>>, vector<1x1x8x1xf32>
    %85 = vector.shape_cast %84 : vector<1x1x8x1xf32> to vector<8x1xf32>
    %86 = arith.mulf %83, %85 : vector<8x1xf32>
    %87 = vector.broadcast %76 : vector<8x1xf32> to vector<8x768xf32>
    %88 = arith.subf %67, %87 : vector<8x768xf32>
    %89 = vector.broadcast %86 : vector<8x1xf32> to vector<8x768xf32>
    %90 = arith.mulf %88, %89 : vector<8x768xf32>
    %c0_50 = arith.constant 0 : index
    %c1 = arith.constant 1 : index
    %c0_51 = arith.constant 0 : index
    %c0_52 = arith.constant 0 : index
    %91 = vector.load %arg6[%c0_50, %c1, %c0_51, %c0_52] : memref<2x2x8x1xf32, #tpu.memory_space<vmem>>, vector<1x1x8x1xf32>
    %92 = vector.shape_cast %91 : vector<1x1x8x1xf32> to vector<8x1xf32>
    %93 = vector.broadcast %92 : vector<8x1xf32> to vector<8x768xf32>
    %94 = arith.addf %90, %93 : vector<8x768xf32>
    %95 = vector.extract_strided_slice %94 {offsets = [0, 0], sizes = [4, 768], strides = [1, 1]} : vector<8x768xf32> to vector<4x768xf32>
    %96 = vector.extract_strided_slice %94 {offsets = [4, 0], sizes = [4, 768], strides = [1, 1]} : vector<8x768xf32> to vector<4x768xf32>
    %97 = arith.negf %96 : vector<4x768xf32>
    %98 = math.exp %97 : vector<4x768xf32>
    %cst_53 = arith.constant 1.000000e+00 : f32
    %99 = vector.broadcast %cst_53 : f32 to vector<4x768xf32>
    %100 = arith.addf %99, %98 : vector<4x768xf32>
    %101 = arith.divf %99, %100 : vector<4x768xf32>
    %102 = arith.mulf %95, %101 : vector<4x768xf32>
    %cst_54 = arith.constant 0.000000e+00 : bf16
    %103 = vector.broadcast %cst_54 : bf16 to vector<2x4x25xbf16>
    %c0_55 = arith.constant 0 : index
    %c0_56 = arith.constant 0 : index
    %c103 = arith.constant 103 : index
    %104 = vector.load %arg10[%c0_55, %c0_56, %c103] : memref<2x4x640xbf16, #tpu.memory_space<vmem>>, vector<2x4x25xbf16>
    tpu.vector_store %arg10[%c0_55, %c0_56, %c103], %103 {strides = array<i32>} : memref<2x4x640xbf16, #tpu.memory_space<vmem>>, vector<2x4x25xbf16>,
    %c0_57 = arith.constant 0 : index
    %c0_58 = arith.constant 0 : index
    %c512 = arith.constant 512 : index
    %105 = vector.load %arg10[%c0_57, %c0_58, %c512] : memref<2x4x640xbf16, #tpu.memory_space<vmem>>, vector<2x4x25xbf16>
    tpu.vector_store %arg10[%c0_57, %c0_58, %c512], %103 {strides = array<i32>} : memref<2x4x640xbf16, #tpu.memory_space<vmem>>, vector<2x4x25xbf16>,
    %106 = vector.broadcast %0 : vector<1x768xf32> to vector<4x768xf32>
    %107 = arith.mulf %102, %106 : vector<4x768xf32>
    %108 = vector.extract_strided_slice %107 {offsets = [0, 0], sizes = [4, 384], strides = [1, 1]} : vector<4x768xf32> to vector<4x384xf32>
    %109 = arith.truncf %108 : vector<4x384xf32> to vector<4x384xbf16>
    %c0_59 = arith.constant 0 : index
    %c0_60 = arith.constant 0 : index
    %c128 = arith.constant 128 : index
    %110 = vector.load %arg10[%c0_59, %c0_60, %c128] : memref<2x4x640xbf16, #tpu.memory_space<vmem>>, vector<1x4x384xbf16>
    %111 = vector.shape_cast %110 : vector<1x4x384xbf16> to vector<4x384xbf16>
    %112 = vector.shape_cast %109 : vector<4x384xbf16> to vector<1x4x384xbf16>
    tpu.vector_store %arg10[%c0_59, %c0_60, %c128], %112 {strides = array<i32>} : memref<2x4x640xbf16, #tpu.memory_space<vmem>>, vector<1x4x384xbf16>,
    %113 = vector.extract_strided_slice %107 {offsets = [0, 384], sizes = [4, 384], strides = [1, 1]} : vector<4x768xf32> to vector<4x384xf32>
    %114 = arith.truncf %113 : vector<4x384xf32> to vector<4x384xbf16>
    %c1_61 = arith.constant 1 : index
    %c0_62 = arith.constant 0 : index
    %c128_63 = arith.constant 128 : index
    %115 = vector.load %arg10[%c1_61, %c0_62, %c128_63] : memref<2x4x640xbf16, #tpu.memory_space<vmem>>, vector<1x4x384xbf16>
    %116 = vector.shape_cast %115 : vector<1x4x384xbf16> to vector<4x384xbf16>
    %117 = vector.shape_cast %114 : vector<4x384xbf16> to vector<1x4x384xbf16>
    tpu.vector_store %arg10[%c1_61, %c0_62, %c128_63], %117 {strides = array<i32>} : memref<2x4x640xbf16, #tpu.memory_space<vmem>>, vector<1x4x384xbf16>,
    %c0_64 = arith.constant 0 : index
    %c0_65 = arith.constant 0 : index
    %c103_66 = arith.constant 103 : index
    %118 = vector.load %arg10[%c0_64, %c0_65, %c103_66] : memref<2x4x640xbf16, #tpu.memory_space<vmem>>, vector<1x4x384xbf16>
    %119 = vector.shape_cast %118 : vector<1x4x384xbf16> to vector<4x384xbf16>
    %c0_67 = arith.constant 0 : index
    %c0_68 = arith.constant 0 : index
    %120 = vector.load %arg11[%c0_67, %c0_68] : memref<36x768xbf16, #tpu.memory_space<vmem>>, vector<4x384xbf16>
    tpu.vector_store %arg11[%c0_67, %c0_68], %119 {strides = array<i32>} : memref<36x768xbf16, #tpu.memory_space<vmem>>, vector<4x384xbf16>,
    %c0_69 = arith.constant 0 : index
    %c0_70 = arith.constant 0 : index
    %c104 = arith.constant 104 : index
    %121 = vector.load %arg10[%c0_69, %c0_70, %c104] : memref<2x4x640xbf16, #tpu.memory_space<vmem>>, vector<1x4x384xbf16>
    %122 = vector.shape_cast %121 : vector<1x4x384xbf16> to vector<4x384xbf16>
    %c4_71 = arith.constant 4 : index
    %c0_72 = arith.constant 0 : index
    %123 = vector.load %arg11[%c4_71, %c0_72] : memref<36x768xbf16, #tpu.memory_space<vmem>>, vector<4x384xbf16>
    tpu.vector_store %arg11[%c4_71, %c0_72], %122 {strides = array<i32>} : memref<36x768xbf16, #tpu.memory_space<vmem>>, vector<4x384xbf16>,
    %c0_73 = arith.constant 0 : index
    %c0_74 = arith.constant 0 : index
    %c105 = arith.constant 105 : index
    %124 = vector.load %arg10[%c0_73, %c0_74, %c105] : memref<2x4x640xbf16, #tpu.memory_space<vmem>>, vector<1x4x384xbf16>
    %125 = vector.shape_cast %124 : vector<1x4x384xbf16> to vector<4x384xbf16>
    %c8_75 = arith.constant 8 : index
    %c0_76 = arith.constant 0 : index
    %126 = vector.load %arg11[%c8_75, %c0_76] : memref<36x768xbf16, #tpu.memory_space<vmem>>, vector<4x384xbf16>
    tpu.vector_store %arg11[%c8_75, %c0_76], %125 {strides = array<i32>} : memref<36x768xbf16, #tpu.memory_space<vmem>>, vector<4x384xbf16>,
    %c0_77 = arith.constant 0 : index
    %c0_78 = arith.constant 0 : index
    %c127 = arith.constant 127 : index
    %127 = vector.load %arg10[%c0_77, %c0_78, %c127] : memref<2x4x640xbf16, #tpu.memory_space<vmem>>, vector<1x4x384xbf16>
    %128 = vector.shape_cast %127 : vector<1x4x384xbf16> to vector<4x384xbf16>
    %c12_79 = arith.constant 12 : index
    %c0_80 = arith.constant 0 : index
    %129 = vector.load %arg11[%c12_79, %c0_80] : memref<36x768xbf16, #tpu.memory_space<vmem>>, vector<4x384xbf16>
    tpu.vector_store %arg11[%c12_79, %c0_80], %128 {strides = array<i32>} : memref<36x768xbf16, #tpu.memory_space<vmem>>, vector<4x384xbf16>,
    %c0_81 = arith.constant 0 : index
    %c0_82 = arith.constant 0 : index
    %c128_83 = arith.constant 128 : index
    %130 = vector.load %arg10[%c0_81, %c0_82, %c128_83] : memref<2x4x640xbf16, #tpu.memory_space<vmem>>, vector<1x4x384xbf16>
    %131 = vector.shape_cast %130 : vector<1x4x384xbf16> to vector<4x384xbf16>
    %c16_84 = arith.constant 16 : index
    %c0_85 = arith.constant 0 : index
    %132 = vector.load %arg11[%c16_84, %c0_85] : memref<36x768xbf16, #tpu.memory_space<vmem>>, vector<4x384xbf16>
    tpu.vector_store %arg11[%c16_84, %c0_85], %131 {strides = array<i32>} : memref<36x768xbf16, #tpu.memory_space<vmem>>, vector<4x384xbf16>,
    %c0_86 = arith.constant 0 : index
    %c0_87 = arith.constant 0 : index
    %c129 = arith.constant 129 : index
    %133 = vector.load %arg10[%c0_86, %c0_87, %c129] : memref<2x4x640xbf16, #tpu.memory_space<vmem>>, vector<1x4x384xbf16>
    %134 = vector.shape_cast %133 : vector<1x4x384xbf16> to vector<4x384xbf16>
    %c20_88 = arith.constant 20 : index
    %c0_89 = arith.constant 0 : index
    %135 = vector.load %arg11[%c20_88, %c0_89] : memref<36x768xbf16, #tpu.memory_space<vmem>>, vector<4x384xbf16>
    tpu.vector_store %arg11[%c20_88, %c0_89], %134 {strides = array<i32>} : memref<36x768xbf16, #tpu.memory_space<vmem>>, vector<4x384xbf16>,
    %c0_90 = arith.constant 0 : index
    %c0_91 = arith.constant 0 : index
    %c151 = arith.constant 151 : index
    %136 = vector.load %arg10[%c0_90, %c0_91, %c151] : memref<2x4x640xbf16, #tpu.memory_space<vmem>>, vector<1x4x384xbf16>
    %137 = vector.shape_cast %136 : vector<1x4x384xbf16> to vector<4x384xbf16>
    %c24_92 = arith.constant 24 : index
    %c0_93 = arith.constant 0 : index
    %138 = vector.load %arg11[%c24_92, %c0_93] : memref<36x768xbf16, #tpu.memory_space<vmem>>, vector<4x384xbf16>
    tpu.vector_store %arg11[%c24_92, %c0_93], %137 {strides = array<i32>} : memref<36x768xbf16, #tpu.memory_space<vmem>>, vector<4x384xbf16>,
    %c0_94 = arith.constant 0 : index
    %c0_95 = arith.constant 0 : index
    %c152 = arith.constant 152 : index
    %139 = vector.load %arg10[%c0_94, %c0_95, %c152] : memref<2x4x640xbf16, #tpu.memory_space<vmem>>, vector<1x4x384xbf16>
    %140 = vector.shape_cast %139 : vector<1x4x384xbf16> to vector<4x384xbf16>
    %c28_96 = arith.constant 28 : index
    %c0_97 = arith.constant 0 : index
    %141 = vector.load %arg11[%c28_96, %c0_97] : memref<36x768xbf16, #tpu.memory_space<vmem>>, vector<4x384xbf16>
    tpu.vector_store %arg11[%c28_96, %c0_97], %140 {strides = array<i32>} : memref<36x768xbf16, #tpu.memory_space<vmem>>, vector<4x384xbf16>,
    %c0_98 = arith.constant 0 : index
    %c0_99 = arith.constant 0 : index
    %c153 = arith.constant 153 : index
    %142 = vector.load %arg10[%c0_98, %c0_99, %c153] : memref<2x4x640xbf16, #tpu.memory_space<vmem>>, vector<1x4x384xbf16>
    %143 = vector.shape_cast %142 : vector<1x4x384xbf16> to vector<4x384xbf16>
    %c32_100 = arith.constant 32 : index
    %c0_101 = arith.constant 0 : index
    %144 = vector.load %arg11[%c32_100, %c0_101] : memref<36x768xbf16, #tpu.memory_space<vmem>>, vector<4x384xbf16>
    tpu.vector_store %arg11[%c32_100, %c0_101], %143 {strides = array<i32>} : memref<36x768xbf16, #tpu.memory_space<vmem>>, vector<4x384xbf16>,
    %c1_102 = arith.constant 1 : index
    %c0_103 = arith.constant 0 : index
    %c103_104 = arith.constant 103 : index
    %145 = vector.load %arg10[%c1_102, %c0_103, %c103_104] : memref<2x4x640xbf16, #tpu.memory_space<vmem>>, vector<1x4x384xbf16>
    %146 = vector.shape_cast %145 : vector<1x4x384xbf16> to vector<4x384xbf16>
    %c0_105 = arith.constant 0 : index
    %c384_106 = arith.constant 384 : index
    %147 = vector.load %arg11[%c0_105, %c384_106] : memref<36x768xbf16, #tpu.memory_space<vmem>>, vector<4x384xbf16>
    tpu.vector_store %arg11[%c0_105, %c384_106], %146 {strides = array<i32>} : memref<36x768xbf16, #tpu.memory_space<vmem>>, vector<4x384xbf16>,
    %c1_107 = arith.constant 1 : index
    %c0_108 = arith.constant 0 : index
    %c104_109 = arith.constant 104 : index
    %148 = vector.load %arg10[%c1_107, %c0_108, %c104_109] : memref<2x4x640xbf16, #tpu.memory_space<vmem>>, vector<1x4x384xbf16>
    %149 = vector.shape_cast %148 : vector<1x4x384xbf16> to vector<4x384xbf16>
    %c4_110 = arith.constant 4 : index
    %c384_111 = arith.constant 384 : index
    %150 = vector.load %arg11[%c4_110, %c384_111] : memref<36x768xbf16, #tpu.memory_space<vmem>>, vector<4x384xbf16>
    tpu.vector_store %arg11[%c4_110, %c384_111], %149 {strides = array<i32>} : memref<36x768xbf16, #tpu.memory_space<vmem>>, vector<4x384xbf16>,
    %c1_112 = arith.constant 1 : index
    %c0_113 = arith.constant 0 : index
    %c105_114 = arith.constant 105 : index
    %151 = vector.load %arg10[%c1_112, %c0_113, %c105_114] : memref<2x4x640xbf16, #tpu.memory_space<vmem>>, vector<1x4x384xbf16>
    %152 = vector.shape_cast %151 : vector<1x4x384xbf16> to vector<4x384xbf16>
    %c8_115 = arith.constant 8 : index
    %c384_116 = arith.constant 384 : index
    %153 = vector.load %arg11[%c8_115, %c384_116] : memref<36x768xbf16, #tpu.memory_space<vmem>>, vector<4x384xbf16>
    tpu.vector_store %arg11[%c8_115, %c384_116], %152 {strides = array<i32>} : memref<36x768xbf16, #tpu.memory_space<vmem>>, vector<4x384xbf16>,
    %c1_117 = arith.constant 1 : index
    %c0_118 = arith.constant 0 : index
    %c127_119 = arith.constant 127 : index
    %154 = vector.load %arg10[%c1_117, %c0_118, %c127_119] : memref<2x4x640xbf16, #tpu.memory_space<vmem>>, vector<1x4x384xbf16>
    %155 = vector.shape_cast %154 : vector<1x4x384xbf16> to vector<4x384xbf16>
    %c12_120 = arith.constant 12 : index
    %c384_121 = arith.constant 384 : index
    %156 = vector.load %arg11[%c12_120, %c384_121] : memref<36x768xbf16, #tpu.memory_space<vmem>>, vector<4x384xbf16>
    tpu.vector_store %arg11[%c12_120, %c384_121], %155 {strides = array<i32>} : memref<36x768xbf16, #tpu.memory_space<vmem>>, vector<4x384xbf16>,
    %c1_122 = arith.constant 1 : index
    %c0_123 = arith.constant 0 : index
    %c128_124 = arith.constant 128 : index
    %157 = vector.load %arg10[%c1_122, %c0_123, %c128_124] : memref<2x4x640xbf16, #tpu.memory_space<vmem>>, vector<1x4x384xbf16>
    %158 = vector.shape_cast %157 : vector<1x4x384xbf16> to vector<4x384xbf16>
    %c16_125 = arith.constant 16 : index
    %c384_126 = arith.constant 384 : index
    %159 = vector.load %arg11[%c16_125, %c384_126] : memref<36x768xbf16, #tpu.memory_space<vmem>>, vector<4x384xbf16>
    tpu.vector_store %arg11[%c16_125, %c384_126], %158 {strides = array<i32>} : memref<36x768xbf16, #tpu.memory_space<vmem>>, vector<4x384xbf16>,
    %c1_127 = arith.constant 1 : index
    %c0_128 = arith.constant 0 : index
    %c129_129 = arith.constant 129 : index
    %160 = vector.load %arg10[%c1_127, %c0_128, %c129_129] : memref<2x4x640xbf16, #tpu.memory_space<vmem>>, vector<1x4x384xbf16>
    %161 = vector.shape_cast %160 : vector<1x4x384xbf16> to vector<4x384xbf16>
    %c20_130 = arith.constant 20 : index
    %c384_131 = arith.constant 384 : index
    %162 = vector.load %arg11[%c20_130, %c384_131] : memref<36x768xbf16, #tpu.memory_space<vmem>>, vector<4x384xbf16>
    tpu.vector_store %arg11[%c20_130, %c384_131], %161 {strides = array<i32>} : memref<36x768xbf16, #tpu.memory_space<vmem>>, vector<4x384xbf16>,
    %c1_132 = arith.constant 1 : index
    %c0_133 = arith.constant 0 : index
    %c151_134 = arith.constant 151 : index
    %163 = vector.load %arg10[%c1_132, %c0_133, %c151_134] : memref<2x4x640xbf16, #tpu.memory_space<vmem>>, vector<1x4x384xbf16>
    %164 = vector.shape_cast %163 : vector<1x4x384xbf16> to vector<4x384xbf16>
    %c24_135 = arith.constant 24 : index
    %c384_136 = arith.constant 384 : index
    %165 = vector.load %arg11[%c24_135, %c384_136] : memref<36x768xbf16, #tpu.memory_space<vmem>>, vector<4x384xbf16>
    tpu.vector_store %arg11[%c24_135, %c384_136], %164 {strides = array<i32>} : memref<36x768xbf16, #tpu.memory_space<vmem>>, vector<4x384xbf16>,
    %c1_137 = arith.constant 1 : index
    %c0_138 = arith.constant 0 : index
    %c152_139 = arith.constant 152 : index
    %166 = vector.load %arg10[%c1_137, %c0_138, %c152_139] : memref<2x4x640xbf16, #tpu.memory_space<vmem>>, vector<1x4x384xbf16>
    %167 = vector.shape_cast %166 : vector<1x4x384xbf16> to vector<4x384xbf16>
    %c28_140 = arith.constant 28 : index
    %c384_141 = arith.constant 384 : index
    %168 = vector.load %arg11[%c28_140, %c384_141] : memref<36x768xbf16, #tpu.memory_space<vmem>>, vector<4x384xbf16>
    tpu.vector_store %arg11[%c28_140, %c384_141], %167 {strides = array<i32>} : memref<36x768xbf16, #tpu.memory_space<vmem>>, vector<4x384xbf16>,
    %c1_142 = arith.constant 1 : index
    %c0_143 = arith.constant 0 : index
    %c153_144 = arith.constant 153 : index
    %169 = vector.load %arg10[%c1_142, %c0_143, %c153_144] : memref<2x4x640xbf16, #tpu.memory_space<vmem>>, vector<1x4x384xbf16>
    %170 = vector.shape_cast %169 : vector<1x4x384xbf16> to vector<4x384xbf16>
    %c32_145 = arith.constant 32 : index
    %c384_146 = arith.constant 384 : index
    %171 = vector.load %arg11[%c32_145, %c384_146] : memref<36x768xbf16, #tpu.memory_space<vmem>>, vector<4x384xbf16>
    tpu.vector_store %arg11[%c32_145, %c384_146], %170 {strides = array<i32>} : memref<36x768xbf16, #tpu.memory_space<vmem>>, vector<4x384xbf16>,
    %c0_147 = arith.constant 0 : index
    %c0_148 = arith.constant 0 : index
    %172 = vector.load %arg5[%c0_147, %c0_148] : memref<8x36xbf16, #tpu.memory_space<vmem>>, vector<8x36xbf16>
    %c0_149 = arith.constant 0 : index
    %c0_150 = arith.constant 0 : index
    %173 = vector.load %arg11[%c0_149, %c0_150] : memref<36x768xbf16, #tpu.memory_space<vmem>>, vector<36x768xbf16>
    %cst_151 = arith.constant dense<0.000000e+00> : vector<8x768xf32>
    %174 = tpu.matmul %172, %173, %cst_151 {dimension_numbers = #tpu.dot_dimension_numbers<[1], [0], [0], [1], [0, 0, 1, 1], [], []>} : vector<8x36xbf16>, vector<36x768xbf16>, vector<8x768xf32> -> vector<8x768xf32>
    %c1_152 = arith.constant 1 : index
    %175 = memref.load %arg1[%c1_152] : memref<2xf32, #tpu.memory_space<smem>>
    %c1_153 = arith.constant 1 : index
    %c0_154 = arith.constant 0 : index
    %c0_155 = arith.constant 0 : index
    %176 = vector.load %arg7[%c1_153, %c0_154, %c0_155] : memref<2x1x768xf32, #tpu.memory_space<vmem>>, vector<1x1x768xf32>
    %177 = vector.shape_cast %176 : vector<1x1x768xf32> to vector<1x768xf32>
    %178 = vector.broadcast %175 : f32 to vector<1x768xf32>
    %179 = arith.mulf %178, %177 : vector<1x768xf32>
    %180 = vector.broadcast %179 : vector<1x768xf32> to vector<8x768xf32>
    %181 = arith.addf %174, %180 : vector<8x768xf32>
    %182 = vector.broadcast %0 : vector<1x768xf32> to vector<8x768xf32>
    %183 = arith.mulf %181, %182 : vector<8x768xf32>
    %cst_156 = arith.constant dense<0.000000e+00> : vector<8xf32>
    %184 = vector.multi_reduction <add>, %183, %cst_156 [1] : vector<8x768xf32> to vector<8xf32>
    %185 = vector.shape_cast %184 : vector<8xf32> to vector<8x1xf32>
    %186 = arith.mulf %183, %183 : vector<8x768xf32>
    %cst_157 = arith.constant dense<0.000000e+00> : vector<8xf32>
    %187 = vector.multi_reduction <add>, %186, %cst_157 [1] : vector<8x768xf32> to vector<8xf32>
    %188 = vector.shape_cast %187 : vector<8xf32> to vector<8x1xf32>
    %cst_158 = arith.constant 0.001953125 : f32
    %189 = vector.broadcast %cst_158 : f32 to vector<8x1xf32>
    %190 = arith.mulf %185, %189 : vector<8x1xf32>
    %cst_159 = arith.constant 0.001953125 : f32
    %191 = vector.broadcast %cst_159 : f32 to vector<8x1xf32>
    %192 = arith.mulf %188, %191 : vector<8x1xf32>
    %193 = arith.mulf %190, %190 : vector<8x1xf32>
    %194 = arith.subf %192, %193 : vector<8x1xf32>
    %cst_160 = arith.constant 9.99999974E-6 : f32
    %195 = vector.broadcast %cst_160 : f32 to vector<8x1xf32>
    %196 = arith.addf %194, %195 : vector<8x1xf32>
    %197 = math.rsqrt %196 : vector<8x1xf32>
    %c1_161 = arith.constant 1 : index
    %c0_162 = arith.constant 0 : index
    %c0_163 = arith.constant 0 : index
    %c0_164 = arith.constant 0 : index
    %198 = vector.load %arg6[%c1_161, %c0_162, %c0_163, %c0_164] : memref<2x2x8x1xf32, #tpu.memory_space<vmem>>, vector<1x1x8x1xf32>
    %199 = vector.shape_cast %198 : vector<1x1x8x1xf32> to vector<8x1xf32>
    %200 = arith.mulf %197, %199 : vector<8x1xf32>
    %201 = vector.broadcast %190 : vector<8x1xf32> to vector<8x768xf32>
    %202 = arith.subf %181, %201 : vector<8x768xf32>
    %203 = vector.broadcast %200 : vector<8x1xf32> to vector<8x768xf32>
    %204 = arith.mulf %202, %203 : vector<8x768xf32>
    %c1_165 = arith.constant 1 : index
    %c1_166 = arith.constant 1 : index
    %c0_167 = arith.constant 0 : index
    %c0_168 = arith.constant 0 : index
    %205 = vector.load %arg6[%c1_165, %c1_166, %c0_167, %c0_168] : memref<2x2x8x1xf32, #tpu.memory_space<vmem>>, vector<1x1x8x1xf32>
    %206 = vector.shape_cast %205 : vector<1x1x8x1xf32> to vector<8x1xf32>
    %207 = vector.broadcast %206 : vector<8x1xf32> to vector<8x768xf32>
    %208 = arith.addf %204, %207 : vector<8x768xf32>
    %209 = vector.extract_strided_slice %208 {offsets = [0, 0], sizes = [4, 768], strides = [1, 1]} : vector<8x768xf32> to vector<4x768xf32>
    %210 = vector.extract_strided_slice %208 {offsets = [4, 0], sizes = [4, 768], strides = [1, 1]} : vector<8x768xf32> to vector<4x768xf32>
    %211 = arith.negf %210 : vector<4x768xf32>
    %212 = math.exp %211 : vector<4x768xf32>
    %cst_169 = arith.constant 1.000000e+00 : f32
    %213 = vector.broadcast %cst_169 : f32 to vector<4x768xf32>
    %214 = arith.addf %213, %212 : vector<4x768xf32>
    %215 = arith.divf %213, %214 : vector<4x768xf32>
    %216 = arith.mulf %209, %215 : vector<4x768xf32>
    %c0_170 = arith.constant 0 : index
    %c0_171 = arith.constant 0 : index
    %217 = vector.load %arg9[%c0_170, %c0_171] : memref<4x768xf32, #tpu.memory_space<vmem>>, vector<4x768xf32>
    tpu.vector_store %arg9[%c0_170, %c0_171], %216 {strides = array<i32>} : memref<4x768xf32, #tpu.memory_space<vmem>>, vector<4x768xf32>,
    return
  }
  func.func @transform_0(%arg0: i32) -> i32 {
    %c0_i32 = arith.constant 0 : i32
    %c0_i32_0 = arith.constant 0 : i32
    return %c0_i32 : i32
  }
  func.func @transform_1(%arg0: i32) -> (i32, i32) {
    %c0_i32 = arith.constant 0 : i32
    %c0_i32_0 = arith.constant 0 : i32
    %c0_i32_1 = arith.constant 0 : i32
    return %c0_i32, %c0_i32_0 : i32, i32
  }
  func.func @transform_2(%arg0: i32) -> (i32, i32) {
    %c0_i32 = arith.constant 0 : i32
    %c0_i32_0 = arith.constant 0 : i32
    %c0_i32_1 = arith.constant 0 : i32
    return %c0_i32, %c0_i32_0 : i32, i32
  }
  func.func @transform_3(%arg0: i32) -> (i32, i32) {
    %c0_i32 = arith.constant 0 : i32
    %c0_i32_0 = arith.constant 0 : i32
    %c0_i32_1 = arith.constant 0 : i32
    return %c0_i32, %c0_i32_0 : i32, i32
  }
  func.func @transform_4(%arg0: i32) -> (i32, i32) {
    %c0_i32 = arith.constant 0 : i32
    %c0_i32_0 = arith.constant 0 : i32
    %c0_i32_1 = arith.constant 0 : i32
    return %c0_i32, %c0_i32_0 : i32, i32
  }
  func.func @transform_5(%arg0: i32) -> (i32, i32, i32, i32) {
    %c0_i32 = arith.constant 0 : i32
    %c0_i32_0 = arith.constant 0 : i32
    %c0_i32_1 = arith.constant 0 : i32
    %c0_i32_2 = arith.constant 0 : i32
    %c0_i32_3 = arith.constant 0 : i32
    return %c0_i32, %c0_i32_0, %c0_i32_1, %c0_i32_2 : i32, i32, i32, i32
  }
  func.func @transform_6(%arg0: i32) -> (i32, i32, i32) {
    %c0_i32 = arith.constant 0 : i32
    %c0_i32_0 = arith.constant 0 : i32
    %c0_i32_1 = arith.constant 0 : i32
    %c0_i32_2 = arith.constant 0 : i32
    return %c0_i32, %c0_i32_0, %c0_i32_1 : i32, i32, i32
  }
  func.func @transform_7(%arg0: i32) -> (i32, i32) {
    %c0_i32 = arith.constant 0 : i32
    %c0_i32_0 = arith.constant 0 : i32
    %c0_i32_1 = arith.constant 0 : i32
    return %c0_i32, %c0_i32_0 : i32, i32
  }
  func.func @transform_8(%arg0: i32) -> (i32, i32) {
    %c0_i32 = arith.constant 0 : i32
    %c0_i32_0 = arith.constant 0 : i32
    %c0_i32_1 = arith.constant 0 : i32
    return %c0_i32, %c0_i32_0 : i32, i32
  }
}

</mosaic_0001>

<bundles_post_ra>
// kernel: upsampling_comp_block.1
= control target key start
LH: loop header
LB: loop body
LE: loop exit
PB: predicated region body
PF: predicated region fallthrough
CT: control target
= control target key end

     0   :  { %13 = vsyncpa [#allocation5], 0  ;;  %s4222_s0 = inlined_call_operand.vmem [shape: f32[2], index: 0, kind: input, shape index: {}]   ;;  %s4223_s1 = inlined_call_operand.vmem [shape: bf16[8,64], index: 1, kind: input, shape index: {}]   ;;  %s4224_s2 = inlined_call_operand.vmem [shape: bf16[64,3456], index: 2, kind: input, shape index: {}]   ;;  %s4225_s3 = inlined_call_operand.vmem [shape: bf16[8,36], index: 3, kind: input, shape index: {}]   ;;  %s4226_s4 = inlined_call_operand.vmem [shape: bf16[8,36], index: 4, kind: input, shape index: {}]   ;;  %s4227_s5 = inlined_call_operand.vmem [shape: f32[2,2,8,1], index: 5, kind: input, shape index: {}]   ;;  %s4228_s6 = inlined_call_operand.vmem [shape: f32[2,1,768], index: 6, kind: input, shape index: {}]   ;;  %s4229_s7 = inlined_call_operand.vmem [shape: f32[1,768], index: 7, kind: input, shape index: {}]   ;;  %s4230_s8 = inlined_call_operand.vmem [shape: f32[4,768], index: 8, kind: output, shape index: {}]  }
   0x1   :  { %s20_s29 = sshll.u32 %s4222_s0, 4  ;;  %s21_s29 = int_to_ptr.vmem [resolvable:$true] %s20_s29 }
   0x2   :  { %s3448_s30 = scalar_lea.vmem %s21_s29, 16  ;;  %p3453_p1 = scmp.lt.s32.totalorder %s21_s29, %s21_s29 }
   0x3   :  { %p3449_p0 = scmp.ne.s32.totalorder %s21_s29, %s3448_s30  ;;  %p3454_p2 = scmp.lt.s32.totalorder %s3448_s30, %s3448_s30 }
   0x5   :  { %p3455_p3 = por %p3454_p2, %p3453_p1 }
   0x7   :  { %p3456_p4 = pnand %p3455_p3, %p3449_p0 }
   0x9   :  { %3459 = shalt.err (!%p3456_p4)
}
   0xa   :  { %s3462_s9 = smov [#allocation4]  }
   0xb   :  { %23 = dma.vmem_to_smem %s21_s29, 16, %s3462_s9, [#allocation5]  }
   0xc   :  { %3460 = dma.done.wait [#allocation5], 16  }
   0xd   :  { %3461 = vsyncadd [#allocation5], 4294967280 }
   0xe   :  { %41 = sfence }
   0xf   :  { %v3183_v0 = vld [vmem:[%s4224_s2 + $0x4] ss:$108 sps:$4 sm:$0xff]   ;;  %v3185_v1 = vld [vmem:[%s4224_s2 + $0xc] ss:$108 sps:$4 sm:$0xff]   ;;  %v3463_v2 = vmov 0   ;;  %vm701_vm0 = vcmask 523264  }
  0x10   :  { %737 = vmatprep.mubr.bf16.mxu0 %v3463_v2  ;;  %778 = vmatprep.mubr.bf16.mxu1 %v3463_v2  ;;  %v3187_v3 = vld [vmem:[%s4224_s2] ss:$108 sps:$4 sm:$0xff]   ;;  %v3188_v4 = vld [vmem:[%s4224_s2 + $0x8] ss:$108 sps:$4 sm:$0xff]   ;;  %v3191_v6 = vld [vmem:[%s4224_s2 + $0xe4] ss:$108 sps:$4 sm:$0xff]  }
  0x11   :  { %705 = vmatprep.subr.bf16.mxu0 %v3183_v0  ;;  %3181 = vset.pattern.permute.xlu1 %v3463_v2  ;;  %v3189_v5 = vld [vmem:[%s4224_s2 + $0xdc] ss:$108 sps:$4 sm:$0xff]   ;;  %v3193_v7 = vld [vmem:[%s4224_s2 + $0xd8] ss:$108 sps:$4 sm:$0xff]   ;;  %v3194_v8 = vld [vmem:[%s4224_s2 + $0xe0] ss:$108 sps:$4 sm:$0xff]  }
  0x12   :  { %746 = vmatprep.subr.bf16.mxu1 %v3185_v1  ;;  %3182 = vset.pattern.permute.xlu0 %v3463_v2  ;;  %v3195_v9 = vld [vmem:[%s4224_s2 + $0x1b4] ss:$108 sps:$4 sm:$0xff]   ;;  %v3197_v10 = vld [vmem:[%s4224_s2 + $0x1bc] ss:$108 sps:$4 sm:$0xff]   ;;  %v3200_v12 = vld [vmem:[%s4224_s2 + $0x1b8] ss:$108 sps:$4 sm:$0xff]  }
  0x13   :  { %706 = vmatpush1.bf16.msra.mxu0 %v3187_v3  ;;  %747 = vmatpush1.bf16.msra.mxu1 %v3188_v4  ;;  %v3199_v11 = vld [vmem:[%s4224_s2 + $0x1b0] ss:$108 sps:$4 sm:$0xff]   ;;  %v3201_v13 = vld [vmem:[%s4224_s2 + $0x28c] ss:$108 sps:$4 sm:$0xff]   ;;  %v3203_v14 = vld [vmem:[%s4224_s2 + $0x294] ss:$108 sps:$4 sm:$0xff]  }
  0x14   :  { %707 = vmatprep.subr.bf16.mxu0 %v3189_v5  ;;  %748 = vmatprep.subr.bf16.mxu1 %v3191_v6  ;;  %v3205_v15 = vld [vmem:[%s4224_s2 + $0x288] ss:$108 sps:$4 sm:$0xff]   ;;  %v3206_v16 = vld [vmem:[%s4224_s2 + $0x290] ss:$108 sps:$4 sm:$0xff]   ;;  %v3584_v19 = vld [vmem:[%s4223_s1] sm:$0xf] }
  0x15   :  { %v3209_v17 = vld [vmem:[%s4224_s2 + $0x14] ss:$108 sps:$4 sm:$0xff]   ;;  %v3212_v18 = vld [vmem:[%s4224_s2 + $0x1c] ss:$108 sps:$4 sm:$0xff]   ;;  %v3210_v21 = vld [vmem:[%s4224_s2 + $0x18] ss:$108 sps:$4 sm:$0xff]  }
  0x16   :  { %v3207_v20 = vld [vmem:[%s4224_s2 + $0x10] ss:$108 sps:$4 sm:$0xff]   ;;  %v3215_v22 = vld [vmem:[%s4224_s2 + $0xec] ss:$108 sps:$4 sm:$0xff]   ;;  %v3218_v23 = vld [vmem:[%s4224_s2 + $0xf4] ss:$108 sps:$4 sm:$0xff]  }
  0x17   :  { %708 = vmatpush1.bf16.msra.mxu0 %v3193_v7  ;;  %749 = vmatpush1.bf16.msra.mxu1 %v3194_v8  ;;  %v3213_v24 = vld [vmem:[%s4224_s2 + $0xe8] ss:$108 sps:$4 sm:$0xff]   ;;  %v3216_v25 = vld [vmem:[%s4224_s2 + $0xf0] ss:$108 sps:$4 sm:$0xff]   ;;  %v3224_v27 = vld [vmem:[%s4224_s2 + $0x1cc] ss:$108 sps:$4 sm:$0xff]  }
  0x18   :  { %709 = vmatprep.subr.bf16.mxu0 %v3195_v9  ;;  %750 = vmatprep.subr.bf16.mxu1 %v3197_v10  ;;  %v3221_v26 = vld [vmem:[%s4224_s2 + $0x1c4] ss:$108 sps:$4 sm:$0xff]   ;;  %v3219_v28 = vld [vmem:[%s4224_s2 + $0x1c0] ss:$108 sps:$4 sm:$0xff]   ;;  %v3222_v29 = vld [vmem:[%s4224_s2 + $0x1c8] ss:$108 sps:$4 sm:$0xff]  }
  0x19   :  { %v3227_v30 = vld [vmem:[%s4224_s2 + $0x29c] ss:$108 sps:$4 sm:$0xff]   ;;  %v3230_v31 = vld [vmem:[%s4224_s2 + $0x2a4] ss:$108 sps:$4 sm:$0xff]   ;;  %v3228_v33 = vld [vmem:[%s4224_s2 + $0x2a0] ss:$108 sps:$4 sm:$0xff]  }
  0x1a   :  { %v3225_v32 = vld [vmem:[%s4224_s2 + $0x298] ss:$108 sps:$4 sm:$0xff]   ;;  %v3231_v36 = vld [vmem:[%s4224_s2 + $0x20] ss:$108 sps:$4 sm:$0xff]   ;;  %v3234_v37 = vld [vmem:[%s4224_s2 + $0x28] ss:$108 sps:$4 sm:$0xff]  }
  0x1b   :  { %710 = vmatpush1.bf16.msra.mxu0 %v3199_v11  ;;  %751 = vmatpush1.bf16.msra.mxu1 %v3200_v12  ;;  %v3233_v34 = vld [vmem:[%s4224_s2 + $0x24] ss:$108 sps:$4 sm:$0xff]   ;;  %v3236_v35 = vld [vmem:[%s4224_s2 + $0x2c] ss:$108 sps:$4 sm:$0xff]   ;;  %v3239_v38 = vld [vmem:[%s4224_s2 + $0xfc] ss:$108 sps:$4 sm:$0xff]  }
  0x1c   :  { %711 = vmatprep.subr.bf16.mxu0 %v3201_v13  ;;  %752 = vmatprep.subr.bf16.mxu1 %v3203_v14  ;;  %v3242_v39 = vld [vmem:[%s4224_s2 + $0x104] ss:$108 sps:$4 sm:$0xff]   ;;  %v3240_v41 = vld [vmem:[%s4224_s2 + $0x100] ss:$108 sps:$4 sm:$0xff]   ;;  %v3248_v43 = vld [vmem:[%s4224_s2 + $0x1dc] ss:$108 sps:$4 sm:$0xff]  }
  0x1d   :  { %v3237_v40 = vld [vmem:[%s4224_s2 + $0xf8] ss:$108 sps:$4 sm:$0xff]   ;;  %v3245_v42 = vld [vmem:[%s4224_s2 + $0x1d4] ss:$108 sps:$4 sm:$0xff]   ;;  %v3243_v44 = vld [vmem:[%s4224_s2 + $0x1d0] ss:$108 sps:$4 sm:$0xff]  }
  0x1e   :  { %v3246_v45 = vld [vmem:[%s4224_s2 + $0x1d8] ss:$108 sps:$4 sm:$0xff]   ;;  %v3254_v47 = vld [vmem:[%s4224_s2 + $0x2b4] ss:$108 sps:$4 sm:$0xff]   ;;  %v3252_v49 = vld [vmem:[%s4224_s2 + $0x2b0] ss:$108 sps:$4 sm:$0xff]  }
  0x1f   :  { %712 = vmatpush1.bf16.msra.mxu0 %v3205_v15  ;;  %753 = vmatpush1.bf16.msra.mxu1 %v3206_v16  ;;  %v3251_v46 = vld [vmem:[%s4224_s2 + $0x2ac] ss:$108 sps:$4 sm:$0xff]   ;;  %v3249_v48 = vld [vmem:[%s4224_s2 + $0x2a8] ss:$108 sps:$4 sm:$0xff]   ;;  %v3255_v52 = vld [vmem:[%s4224_s2 + $0x30] ss:$108 sps:$4 sm:$0xff]  }
  0x20   :  { %787 = vmatprep.subr.bf16.mxu0 %v3209_v17  ;;  %828 = vmatprep.subr.bf16.mxu1 %v3212_v18  ;;  %v3257_v50 = vld [vmem:[%s4224_s2 + $0x34] ss:$108 sps:$4 sm:$0xff]   ;;  %v3260_v51 = vld [vmem:[%s4224_s2 + $0x3c] ss:$108 sps:$4 sm:$0xff]   ;;  %v3258_v53 = vld [vmem:[%s4224_s2 + $0x38] ss:$108 sps:$4 sm:$0xff]  }
  0x21   :  { %v3263_v54 = vld [vmem:[%s4224_s2 + $0x10c] ss:$108 sps:$4 sm:$0xff]   ;;  %v3266_v55 = vld [vmem:[%s4224_s2 + $0x114] ss:$108 sps:$4 sm:$0xff]   ;;  %v3264_v57 = vld [vmem:[%s4224_s2 + $0x110] ss:$108 sps:$4 sm:$0xff]  }
  0x22   :  { %3020 = vmatmul.mubr.msk.bf16.vlgmr.msra.gmra.mrb[0].mxu0 %vm701_vm0, %v3584_v19  ;;  %3021 = vmatmul.mubr.msk.bf16.vlgmr.msra.gmra.mrb[0].mxu1 %vm701_vm0, %v3584_v19  ;;  %v3261_v56 = vld [vmem:[%s4224_s2 + $0x108] ss:$108 sps:$4 sm:$0xff]   ;;  %v3269_v58 = vld [vmem:[%s4224_s2 + $0x1e4] ss:$108 sps:$4 sm:$0xff]   ;;  %v3272_v59 = vld [vmem:[%s4224_s2 + $0x1ec] ss:$108 sps:$4 sm:$0xff]  }
  0x23   :  { %788 = vmatpush1.bf16.msra.mxu0 %v3207_v20  ;;  %829 = vmatpush1.bf16.msra.mxu1 %v3210_v21  ;;  %v3267_v60 = vld [vmem:[%s4224_s2 + $0x1e0] ss:$108 sps:$4 sm:$0xff]   ;;  %v3270_v61 = vld [vmem:[%s4224_s2 + $0x1e8] ss:$108 sps:$4 sm:$0xff]   ;;  %v3278_v63 = vld [vmem:[%s4224_s2 + $0x2c4] ss:$108 sps:$4 sm:$0xff]  }
  0x24   :  { %789 = vmatprep.subr.bf16.mxu0 %v3215_v22  ;;  %830 = vmatprep.subr.bf16.mxu1 %v3218_v23  ;;  %v3275_v62 = vld [vmem:[%s4224_s2 + $0x2bc] ss:$108 sps:$4 sm:$0xff]   ;;  %v3273_v0 = vld [vmem:[%s4224_s2 + $0x2b8] ss:$108 sps:$4 sm:$0xff]   ;;  %v3276_v1 = vld [vmem:[%s4224_s2 + $0x2c0] ss:$108 sps:$4 sm:$0xff]  }
  0x25   :  { %819 = vmatprep.mubr.bf16.mxu0 %v3463_v2  ;;  %860 = vmatprep.mubr.bf16.mxu1 %v3463_v2  ;;  %v3281_v3 = vld [vmem:[%s4224_s2 + $0x44] ss:$108 sps:$4 sm:$0xff]   ;;  %v3284_v4 = vld [vmem:[%s4224_s2 + $0x4c] ss:$108 sps:$4 sm:$0xff]   ;;  %v3282_v6 = vld [vmem:[%s4224_s2 + $0x48] ss:$108 sps:$4 sm:$0xff]  }
  0x26   :  { %v3279_v5 = vld [vmem:[%s4224_s2 + $0x40] ss:$108 sps:$4 sm:$0xff]   ;;  %v3287_v7 = vld [vmem:[%s4224_s2 + $0x11c] ss:$108 sps:$4 sm:$0xff]   ;;  %v3290_v8 = vld [vmem:[%s4224_s2 + $0x124] ss:$108 sps:$4 sm:$0xff]  }
  0x27   :  { %790 = vmatpush1.bf16.msra.mxu0 %v3213_v24  ;;  %831 = vmatpush1.bf16.msra.mxu1 %v3216_v25  ;;  %v3285_v9 = vld [vmem:[%s4224_s2 + $0x118] ss:$108 sps:$4 sm:$0xff]   ;;  %v3288_v10 = vld [vmem:[%s4224_s2 + $0x120] ss:$108 sps:$4 sm:$0xff]   ;;  %v3296_v12 = vld [vmem:[%s4224_s2 + $0x1fc] ss:$108 sps:$4 sm:$0xff]  }
  0x28   :  { %791 = vmatprep.subr.bf16.mxu0 %v3221_v26  ;;  %832 = vmatprep.subr.bf16.mxu1 %v3224_v27  ;;  %v3293_v11 = vld [vmem:[%s4224_s2 + $0x1f4] ss:$108 sps:$4 sm:$0xff]   ;;  %v3291_v13 = vld [vmem:[%s4224_s2 + $0x1f0] ss:$108 sps:$4 sm:$0xff]   ;;  %v3294_v14 = vld [vmem:[%s4224_s2 + $0x1f8] ss:$108 sps:$4 sm:$0xff]  }
  0x29   :  { %v3299_v15 = vld [vmem:[%s4224_s2 + $0x2cc] ss:$108 sps:$4 sm:$0xff]   ;;  %v3302_v16 = vld [vmem:[%s4224_s2 + $0x2d4] ss:$108 sps:$4 sm:$0xff]   ;;  %v3300_v18 = vld [vmem:[%s4224_s2 + $0x2d0] ss:$108 sps:$4 sm:$0xff]  }
  0x2a   :  { %v3297_v17 = vld [vmem:[%s4224_s2 + $0x2c8] ss:$108 sps:$4 sm:$0xff]   ;;  %v3303_v22 = vld [vmem:[%s4224_s2 + $0x50] ss:$108 sps:$4 sm:$0xff]   ;;  %v3306_v23 = vld [vmem:[%s4224_s2 + $0x58] ss:$108 sps:$4 sm:$0xff]  }
  0x2b   :  { %792 = vmatpush1.bf16.msra.mxu0 %v3219_v28  ;;  %833 = vmatpush1.bf16.msra.mxu1 %v3222_v29  ;;  %v3305_v20 = vld [vmem:[%s4224_s2 + $0x54] ss:$108 sps:$4 sm:$0xff]   ;;  %v3308_v21 = vld [vmem:[%s4224_s2 + $0x5c] ss:$108 sps:$4 sm:$0xff]   ;;  %v3311_v24 = vld [vmem:[%s4224_s2 + $0x12c] ss:$108 sps:$4 sm:$0xff]  }
  0x2c   :  { %793 = vmatprep.subr.bf16.mxu0 %v3227_v30  ;;  %834 = vmatprep.subr.bf16.mxu1 %v3230_v31  ;;  %v3314_v25 = vld [vmem:[%s4224_s2 + $0x134] ss:$108 sps:$4 sm:$0xff]   ;;  %v3312_v27 = vld [vmem:[%s4224_s2 + $0x130] ss:$108 sps:$4 sm:$0xff]   ;;  %v3320_v29 = vld [vmem:[%s4224_s2 + $0x20c] ss:$108 sps:$4 sm:$0xff]  }
  0x2d   :  { %v3309_v26 = vld [vmem:[%s4224_s2 + $0x128] ss:$108 sps:$4 sm:$0xff]   ;;  %v3317_v28 = vld [vmem:[%s4224_s2 + $0x204] ss:$108 sps:$4 sm:$0xff]   ;;  %v3315_v30 = vld [vmem:[%s4224_s2 + $0x200] ss:$108 sps:$4 sm:$0xff]  }
  0x2e   :  { %v3318_v31 = vld [vmem:[%s4224_s2 + $0x208] ss:$108 sps:$4 sm:$0xff]   ;;  %vm3465_vm1 = vmmov 0   ;;  %vm1607_vm2 = vcmask 1041408   ;;  %vm1603_vm3 = vcmask 293888   ;;  %vm1904_vm4 = vcmask 1042232  }
  0x2f   :  { %794 = vmatpush1.bf16.msra.mxu0 %v3225_v32  ;;  %835 = vmatpush1.bf16.msra.mxu1 %v3228_v33  ;;  %v3323_v32 = vld [vmem:[%s4224_s2 + $0x2dc] ss:$108 sps:$4 sm:$0xff]   ;;  %v3326_v33 = vld [vmem:[%s4224_s2 + $0x2e4] ss:$108 sps:$4 sm:$0xff]   ;;  %vm1907_vm5 = vcmask 197632   ;;  %s3467_s20 = smov 24  }
  0x30   :  { %869 = vmatprep.subr.bf16.mxu0 %v3233_v34  ;;  %910 = vmatprep.subr.bf16.mxu1 %v3236_v35  ;;  %v3321_v34 = vld [vmem:[%s4224_s2 + $0x2d8] ss:$108 sps:$4 sm:$0xff]   ;;  %v3324_v35 = vld [vmem:[%s4224_s2 + $0x2e0] ss:$108 sps:$4 sm:$0xff]   ;;  %1905 = vst.msk [vmem:[#allocation2] sm:$0x3] %vm1904_vm4, %v3463_v2 }
  0x31   :  { %1906 = vst.msk [vmem:[#allocation2 + $0xa] sm:$0x3] %vm1904_vm4, %v3463_v2  ;;  %s3468_s21 = smov 25   ;;  %s3469_s22 = smov 23   ;;  %vm2021_vm6 = vcmask 195584   ;;  %vm2083_vm7 = vcmask 7168  }
  0x32   :  { %3022 = vmatmul.mubr.msk.bf16.vlgmr.msra.gmra.mrb[4].mxu0 %vm701_vm0, %v3584_v19  ;;  %3023 = vmatmul.mubr.msk.bf16.vlgmr.msra.gmra.mrb[4].mxu1 %vm701_vm0, %v3584_v19  ;;  %1908 = vst.msk [vmem:[#allocation2 + $0x8] sm:$0x3] %vm1907_vm5, %v3463_v2  ;;  %1909 = vst.msk [vmem:[#allocation2 + $0x12] sm:$0x3] %vm1907_vm5, %v3463_v2  ;;  %s3470_s23 = smov 1   ;;  %s3471_s24 = smov 105  }
  0x33   :  { %870 = vmatpush1.bf16.msra.mxu0 %v3231_v36  ;;  %911 = vmatpush1.bf16.msra.mxu1 %v3234_v37  ;;  %v3329_v36 = vld [vmem:[%s4224_s2 + $0x64] ss:$108 sps:$4 sm:$0xff]   ;;  %v3327_v37 = vld [vmem:[%s4224_s2 + $0x60] ss:$108 sps:$4 sm:$0xff]   ;;  %s3472_s25 = smov 127   ;;  %s3473_s26 = smov 103  }
  0x34   :  { %871 = vmatprep.subr.bf16.mxu0 %v3239_v38  ;;  %912 = vmatprep.subr.bf16.mxu1 %v3242_v39  ;;  %v3330_v38 = vld [vmem:[%s4224_s2 + $0x68] ss:$108 sps:$4 sm:$0xff]   ;;  %v3464_v39 = vmov 0.0   ;;  %s3474_s27 = smov 104   ;;  %vm2135_vm8 = vcmask 1039360   ;;  %vm2197_vm9 = vcmask 850944  }
  0x35   :  { %901 = vmatprep.mubr.bf16.mxu0 %v3463_v2  ;;  %942 = vmatprep.mubr.bf16.mxu1 %v3463_v2  ;;  %vm1988_vm10 = vcmask 1043456   ;;  %vm1990_vm11 = vcmask 203776   ;;  %vm2166_vm12 = vcmask 859136   ;;  %vm2228_vm13 = vcmask 842752  }
  0x36   :  { %vm2052_vm14 = vcmask 187392  }
  0x37   :  { %872 = vmatpush1.bf16.msra.mxu0 %v3237_v40  ;;  %913 = vmatpush1.bf16.msra.mxu1 %v3240_v41  ;;  %v3333_v40 = vld [vmem:[%s4224_s2 + $0x13c] ss:$108 sps:$4 sm:$0xff]   ;;  %v3331_v41 = vld [vmem:[%s4224_s2 + $0x138] ss:$108 sps:$4 sm:$0xff]  }
  0x38   :  { %873 = vmatprep.subr.bf16.mxu0 %v3245_v42  ;;  %914 = vmatprep.subr.bf16.mxu1 %v3248_v43  ;;  %v3334_v42 = vld [vmem:[%s4224_s2 + $0x140] ss:$108 sps:$4 sm:$0xff]  }
  0x39   :  { %v3337_v43 = vld [vmem:[%s4224_s2 + $0x214] ss:$108 sps:$4 sm:$0xff]  }
  0x3b   :  { %874 = vmatpush1.bf16.msra.mxu0 %v3243_v44  ;;  %915 = vmatpush1.bf16.msra.mxu1 %v3246_v45  ;;  %v3335_v44 = vld [vmem:[%s4224_s2 + $0x210] ss:$108 sps:$4 sm:$0xff]   ;;  %v3338_v45 = vld [vmem:[%s4224_s2 + $0x218] ss:$108 sps:$4 sm:$0xff]  }
  0x3c   :  { %875 = vmatprep.subr.bf16.mxu0 %v3251_v46  ;;  %916 = vmatprep.subr.bf16.mxu1 %v3254_v47  ;;  %v3341_v46 = vld [vmem:[%s4224_s2 + $0x2ec] ss:$108 sps:$4 sm:$0xff]   ;;  %v3339_v47 = vld [vmem:[%s4224_s2 + $0x2e8] ss:$108 sps:$4 sm:$0xff]  }
  0x3f   :  { %876 = vmatpush1.bf16.msra.mxu0 %v3249_v48  ;;  %917 = vmatpush1.bf16.msra.mxu1 %v3252_v49  ;;  %v3342_v48 = vld [vmem:[%s4224_s2 + $0x2f0] ss:$108 sps:$4 sm:$0xff]  }
  0x40   :  { %951 = vmatprep.subr.bf16.mxu0 %v3257_v50  ;;  %992 = vmatprep.subr.bf16.mxu1 %v3260_v51 }
  0x42   :  { %3024 = vmatmul.mubr.msk.bf16.vlgmr.msra.gmra.mrb[8].mxu0 %vm701_vm0, %v3584_v19  ;;  %3025 = vmatmul.mubr.msk.bf16.vlgmr.msra.gmra.mrb[8].mxu1 %vm701_vm0, %v3584_v19 }
  0x43   :  { %952 = vmatpush1.bf16.msra.mxu0 %v3255_v52  ;;  %993 = vmatpush1.bf16.msra.mxu1 %v3258_v53 }
  0x44   :  { %953 = vmatprep.subr.bf16.mxu0 %v3263_v54  ;;  %994 = vmatprep.subr.bf16.mxu1 %v3266_v55 }
  0x45   :  { %983 = vmatprep.mubr.bf16.mxu0 %v3463_v2  ;;  %1024 = vmatprep.mubr.bf16.mxu1 %v3463_v2 }
  0x47   :  { %954 = vmatpush1.bf16.msra.mxu0 %v3261_v56  ;;  %995 = vmatpush1.bf16.msra.mxu1 %v3264_v57 }
  0x48   :  { %955 = vmatprep.subr.bf16.mxu0 %v3269_v58  ;;  %996 = vmatprep.subr.bf16.mxu1 %v3272_v59 }
  0x4b   :  { %956 = vmatpush1.bf16.msra.mxu0 %v3267_v60  ;;  %997 = vmatpush1.bf16.msra.mxu1 %v3270_v61 }
  0x4c   :  { %957 = vmatprep.subr.bf16.mxu0 %v3275_v62  ;;  %998 = vmatprep.subr.bf16.mxu1 %v3278_v63 }
  0x4f   :  { %958 = vmatpush1.bf16.msra.mxu0 %v3273_v0  ;;  %999 = vmatpush1.bf16.msra.mxu1 %v3276_v1 }
  0x50   :  { %1033 = vmatprep.subr.bf16.mxu0 %v3281_v3  ;;  %1074 = vmatprep.subr.bf16.mxu1 %v3284_v4 }
  0x52   :  { %3026 = vmatmul.mubr.msk.bf16.vlgmr.msra.gmra.mrb[12].mxu0 %vm701_vm0, %v3584_v19  ;;  %3027 = vmatmul.mubr.msk.bf16.vlgmr.msra.gmra.mrb[12].mxu1 %vm701_vm0, %v3584_v19 }
  0x53   :  { %1034 = vmatpush1.bf16.msra.mxu0 %v3279_v5  ;;  %1075 = vmatpush1.bf16.msra.mxu1 %v3282_v6 }
  0x54   :  { %1035 = vmatprep.subr.bf16.mxu0 %v3287_v7  ;;  %1076 = vmatprep.subr.bf16.mxu1 %v3290_v8 }
  0x55   :  { %1065 = vmatprep.mubr.bf16.mxu0 %v3463_v2  ;;  %1106 = vmatprep.mubr.bf16.mxu1 %v3463_v2 }
  0x57   :  { %1036 = vmatpush1.bf16.msra.mxu0 %v3285_v9  ;;  %1077 = vmatpush1.bf16.msra.mxu1 %v3288_v10 }
  0x58   :  { %1037 = vmatprep.subr.bf16.mxu0 %v3293_v11  ;;  %1078 = vmatprep.subr.bf16.mxu1 %v3296_v12 }
  0x5b   :  { %1038 = vmatpush1.bf16.msra.mxu0 %v3291_v13  ;;  %1079 = vmatpush1.bf16.msra.mxu1 %v3294_v14 }
  0x5c   :  { %1039 = vmatprep.subr.bf16.mxu0 %v3299_v15  ;;  %1080 = vmatprep.subr.bf16.mxu1 %v3302_v16 }
  0x5f   :  { %1040 = vmatpush1.bf16.msra.mxu0 %v3297_v17  ;;  %1081 = vmatpush1.bf16.msra.mxu1 %v3300_v18 }
  0x60   :  { %1115 = vmatprep.subr.bf16.mxu0 %v3305_v20  ;;  %1156 = vmatprep.subr.bf16.mxu1 %v3308_v21 }
  0x62   :  { %3028 = vmatmul.mubr.msk.bf16.vlgmr.msra.gmra.mrb[16].mxu0 %vm701_vm0, %v3584_v19  ;;  %3029 = vmatmul.mubr.msk.bf16.vlgmr.msra.gmra.mrb[16].mxu1 %vm701_vm0, %v3584_v19 }
  0x63   :  { %1116 = vmatpush1.bf16.msra.mxu0 %v3303_v22  ;;  %1157 = vmatpush1.bf16.msra.mxu1 %v3306_v23 }
  0x64   :  { %1117 = vmatprep.subr.bf16.mxu0 %v3311_v24  ;;  %1158 = vmatprep.subr.bf16.mxu1 %v3314_v25 }
  0x65   :  { %1147 = vmatprep.mubr.bf16.mxu0 %v3463_v2  ;;  %1188 = vmatprep.mubr.bf16.mxu1 %v3463_v2 }
  0x67   :  { %1118 = vmatpush1.bf16.msra.mxu0 %v3309_v26  ;;  %1159 = vmatpush1.bf16.msra.mxu1 %v3312_v27 }
  0x68   :  { %1119 = vmatprep.subr.bf16.mxu0 %v3317_v28  ;;  %1160 = vmatprep.subr.bf16.mxu1 %v3320_v29 }
  0x6b   :  { %1120 = vmatpush1.bf16.msra.mxu0 %v3315_v30  ;;  %1161 = vmatpush1.bf16.msra.mxu1 %v3318_v31 }
  0x6c   :  { %1121 = vmatprep.subr.bf16.mxu0 %v3323_v32  ;;  %1162 = vmatprep.subr.bf16.mxu1 %v3326_v33 }
  0x6f   :  { %1122 = vmatpush1.bf16.msra.mxu0 %v3321_v34  ;;  %1163 = vmatpush1.bf16.msra.mxu1 %v3324_v35 }
  0x70   :  { %1197 = vmatprep.subr.bf16.mxu0 %v3329_v36  ;;  %3156 = vmatprep.subr.bf16.mxu1 %v3464_v39 }
  0x72   :  { %3030 = vmatmul.mubr.msk.bf16.vlgmr.msra.gmra.mrb[20].mxu0 %vm701_vm0, %v3584_v19  ;;  %3031 = vmatmul.mubr.msk.bf16.vlgmr.msra.gmra.mrb[20].mxu1 %vm701_vm0, %v3584_v19 }
  0x73   :  { %1198 = vmatpush1.bf16.msra.mxu0 %v3327_v37  ;;  %3157 = vmatpush3.bf16.msra.mxu1 %v3330_v38 }
  0x74   :  { %1199 = vmatprep.subr.bf16.mxu0 %v3333_v40  ;;  %3158 = vmatprep.subr.bf16.mxu1 %v3464_v39 }
  0x75   :  { %1229 = vmatprep.mubr.bf16.mxu0 %v3463_v2  ;;  %3164 = vmatprep.mubr.msk.bf16.mxu1 %vm3465_vm1, %v3464_v39 }
  0x77   :  { %1200 = vmatpush1.bf16.msra.mxu0 %v3331_v41  ;;  %3159 = vmatpush3.bf16.msra.mxu1 %v3334_v42 }
  0x78   :  { %1201 = vmatprep.subr.bf16.mxu0 %v3337_v43  ;;  %3160 = vmatprep.subr.bf16.mxu1 %v3464_v39 }
  0x7b   :  { %1202 = vmatpush1.bf16.msra.mxu0 %v3335_v44  ;;  %3161 = vmatpush3.bf16.msra.mxu1 %v3338_v45 }
  0x7c   :  { %1203 = vmatprep.subr.bf16.mxu0 %v3341_v46  ;;  %3162 = vmatprep.subr.bf16.mxu1 %v3464_v39 }
  0x7f   :  { %1204 = vmatpush1.bf16.msra.mxu0 %v3339_v47  ;;  %3163 = vmatpush3.bf16.msra.mxu1 %v3342_v48 }
  0x82   :  { %3032 = vmatmul.mubr.msk.bf16.vlgmr.msra.gmra.mrb[24].mxu0 %vm701_vm0, %v3584_v19  ;;  %3165 = vmatmul.mubr.msk.bf16.vlgmr.msra.gmra.mrb[24].mxu1 %vm701_vm0, %v3584_v19 }
  0x83   :  { %1658 = vmatprep.mubr.bf16.mxu0 %v3463_v2  ;;  %1699 = vmatprep.mubr.bf16.mxu1 %v3463_v2 }
  0xf5   :  { %v739_v49 = vpop.f32.mrb[0].mxu0  ;;  %v780_v50 = vpop.f32.mrb[0].mxu1 }
  0xf6   :  { %v741_v51 = vpop.f32.mrb[1].mxu0  ;;  %v3134_v52 = vpack.c.bf16 %v780_v50, %v780_v50  ;;  %v782_v53 = vpop.f32.mrb[1].mxu1 }
  0xf7   :  { %v3133_v54 = vpack.c.bf16 %v741_v51, %v739_v49  ;;  %v743_v55 = vpop.f32.mrb[2].mxu0  ;;  %v784_v56 = vpop.f32.mrb[2].mxu1 }
  0xf8   :  { %v744_v57 = vpop.f32.mrb[3].mxu0  ;;  %1292 = vst [vmem:[#allocation3 + $0x8] sm:$0x3] %v3134_v52  ;;  %v3053_v58 = vrot.slane %v3134_v52, 10  ;;  %v785_v59 = vpop.f32.mrb[3].mxu1 }
  0xf9   :  { %1291 = vst [vmem:[#allocation3] sm:$0x33] %v3133_v54  ;;  %v3052_v60 = vrot.slane %v3133_v54, 10 }
  0xfa   :  { %1428 = vst [vmem:[#allocation3 + $0x14] sm:$0x3] %v3053_v58 }
  0xfb   :  { %1427 = vst [vmem:[#allocation3 + $0xc] sm:$0x33] %v3052_v60 }
 0x105   :  { %v821_v19 = vpop.f32.mrb[4].mxu0  ;;  %v862_v61 = vpop.f32.mrb[4].mxu1 }
 0x106   :  { %v3135_v62 = vpack.c.bf16 %v821_v19, %v782_v53  ;;  %v823_v63 = vpop.f32.mrb[5].mxu0  ;;  %v864_v0 = vpop.f32.mrb[5].mxu1 }
 0x107   :  { %v3136_v1 = vpack.c.bf16 %v823_v63, %v823_v63  ;;  %v825_v3 = vpop.f32.mrb[6].mxu0  ;;  %v3137_v4 = vpack.c.bf16 %v864_v0, %v862_v61  ;;  %v866_v5 = vpop.f32.mrb[6].mxu1 }
 0x108   :  { %v1304_v6 = vrot.slane %v3135_v62, 6  ;;  %1431 = vst [vmem:[#allocation3 + $0xc] sm:$0xcc] %v3135_v62  ;;  %v826_v7 = vpop.f32.mrb[7].mxu0  ;;  %v867_v8 = vpop.f32.mrb[7].mxu1 }
 0x109   :  { %v1305_v9 = vrot.slane %v3136_v1, 6  ;;  %1432 = vst [vmem:[#allocation3 + $0x14] sm:$0xc] %v3136_v1  ;;  %1323 = vst [vmem:[#allocation3 + $0x18] sm:$0x33] %v3137_v4  ;;  %v3054_v10 = vrot.slane %v3137_v4, 10 }
 0x10a   :  { %1308 = vst [vmem:[#allocation3] sm:$0xcc] %v1304_v6 }
 0x10b   :  { %1309 = vst [vmem:[#allocation3 + $0x8] sm:$0xc] %v1305_v9  ;;  %1439 = vst [vmem:[#allocation3 + $0x24] sm:$0x33] %v3054_v10 }
 0x115   :  { %v903_v11 = vpop.f32.mrb[8].mxu0  ;;  %v944_v12 = vpop.f32.mrb[8].mxu1 }
 0x116   :  { %v3138_v13 = vpack.c.bf16 %v903_v11, %v903_v11  ;;  %v905_v14 = vpop.f32.mrb[9].mxu0  ;;  %v946_v15 = vpop.f32.mrb[9].mxu1 }
 0x117   :  { %v3139_v16 = vpack.c.bf16 %v944_v12, %v905_v14  ;;  %v3140_v17 = vpack.c.bf16 %v946_v15, %v946_v15  ;;  %v907_v18 = vpop.f32.mrb[10].mxu0  ;;  %v948_v20 = vpop.f32.mrb[10].mxu1 }
 0x118   :  { %1324 = vst [vmem:[#allocation3 + $0x20] sm:$0x3] %v3138_v13  ;;  %v3055_v21 = vrot.slane %v3138_v13, 10  ;;  %v908_v22 = vpop.f32.mrb[11].mxu0  ;;  %v949_v23 = vpop.f32.mrb[11].mxu1 }
 0x119   :  { %v1336_v24 = vrot.slane %v3139_v16, 6  ;;  %1443 = vst [vmem:[#allocation3 + $0x24] sm:$0xcc] %v3139_v16  ;;  %v1337_v25 = vrot.slane %v3140_v17, 6  ;;  %1444 = vst [vmem:[#allocation3 + $0x2c] sm:$0xc] %v3140_v17 }
 0x11a   :  { %1440 = vst [vmem:[#allocation3 + $0x2c] sm:$0x3] %v3055_v21 }
 0x11b   :  { %1340 = vst [vmem:[#allocation3 + $0x18] sm:$0xcc] %v1336_v24  ;;  %1341 = vst [vmem:[#allocation3 + $0x20] sm:$0xc] %v1337_v25 }
 0x120   :  { %v3345_v27 = vld [vmem:[#allocation3 + $0xc] ss:$24 sps:$4 sm:$0xff]  }
 0x121   :  { %1667 = vmatprep.subr.bf16.mxu1 %v3345_v27 }
 0x122   :  { %v3343_v26 = vld [vmem:[#allocation3 + $0x4] ss:$24 sps:$4 sm:$0xff]   ;;  %v3347_v28 = vld [vmem:[#allocation3] ss:$24 sps:$4 sm:$0xff]  }
 0x123   :  { %v3348_v29 = vld [vmem:[#allocation3 + $0x8] ss:$24 sps:$4 sm:$0xff]   ;;  %1626 = vmatprep.subr.bf16.mxu0 %v3343_v26 }
 0x124   :  { %1627 = vmatpush1.bf16.msra.mxu0 %v3347_v28  ;;  %1668 = vmatpush1.bf16.msra.mxu1 %v3348_v29  ;;  %v3358_v29 = vld [vmem:[#allocation3 + $0x14] ss:$24 sps:$4 sm:$0xff]  }
 0x125   :  { %v985_v30 = vpop.f32.mrb[12].mxu0  ;;  %v1026_v31 = vpop.f32.mrb[12].mxu1 }
 0x126   :  { %v987_v32 = vpop.f32.mrb[13].mxu0  ;;  %v3142_v33 = vpack.c.bf16 %v1026_v31, %v1026_v31  ;;  %v1028_v34 = vpop.f32.mrb[13].mxu1  ;;  %v1477_v31 = vld [vmem:[%s4225_s3] sm:$0xf]  ;;  %s1493_s3 = sld [smem:[#allocation4]] }
 0x127   :  { %v3141_v35 = vpack.c.bf16 %v987_v32, %v985_v30  ;;  %v989_v36 = vpop.f32.mrb[14].mxu0  ;;  %v1030_v37 = vpop.f32.mrb[14].mxu1 }
 0x128   :  { %v990_v38 = vpop.f32.mrb[15].mxu0  ;;  %1356 = vst [vmem:[#allocation3 + $0x38] sm:$0x3] %v3142_v33  ;;  %v3057_v39 = vrot.slane %v3142_v33, 10  ;;  %v1031_v40 = vpop.f32.mrb[15].mxu1 }
 0x129   :  { %1355 = vst [vmem:[#allocation3 + $0x30] sm:$0x33] %v3141_v35  ;;  %v3056_v41 = vrot.slane %v3141_v35, 10  ;;  %v3361_v33 = vld [vmem:[#allocation3 + $0x10] ss:$24 sps:$4 sm:$0xff]   ;;  %v1498_v40 = vlaneseq }
 0x12a   :  { %1452 = vst [vmem:[#allocation3 + $0x44] sm:$0x3] %v3057_v39 }
 0x12b   :  { %1451 = vst [vmem:[#allocation3 + $0x3c] sm:$0x33] %v3056_v41  ;;  %v3912_v41 = vshrl.u32 %v1498_v40, 7 }
 0x135   :  { %v1067_v42 = vpop.f32.mrb[16].mxu0  ;;  %v1108_v43 = vpop.f32.mrb[16].mxu1 }
 0x136   :  { %v3143_v44 = vpack.c.bf16 %v1067_v42, %v1028_v34  ;;  %v1069_v45 = vpop.f32.mrb[17].mxu0  ;;  %v1110_v46 = vpop.f32.mrb[17].mxu1  ;;  %v1494_v42 = vld [vmem:[%s4228_s6] sm:$0x3f] }
 0x137   :  { %v3144_v47 = vpack.c.bf16 %v1069_v45, %v1069_v45  ;;  %v1071_v48 = vpop.f32.mrb[18].mxu0  ;;  %v3145_v49 = vpack.c.bf16 %v1110_v46, %v1108_v43  ;;  %v1112_v50 = vpop.f32.mrb[18].mxu1  ;;  %v1495_v43 = vstv %s1493_s3  ;;  %v3918_v45 = vsub.s32 0, %v3912_v41 }
 0x138   :  { %v1368_v51 = vrot.slane %v3143_v44, 6  ;;  %1455 = vst [vmem:[#allocation3 + $0x3c] sm:$0xcc] %v3143_v44  ;;  %v1072_v52 = vpop.f32.mrb[19].mxu0  ;;  %v1113_v53 = vpop.f32.mrb[19].mxu1  ;;  %v1496_v44 = vmul.f32 %v1495_v43, %v1494_v42  ;;  %v3921_v46 = vsub.s32 1, %v3912_v41 }
 0x139   :  { %v1369_v54 = vrot.slane %v3144_v47, 6  ;;  %1456 = vst [vmem:[#allocation3 + $0x44] sm:$0xc] %v3144_v47  ;;  %1387 = vst [vmem:[#allocation3 + $0x48] sm:$0x33] %v3145_v49  ;;  %v3058_v55 = vrot.slane %v3145_v49, 10 }
 0x13a   :  { %1372 = vst [vmem:[#allocation3 + $0x30] sm:$0xcc] %v1368_v51  ;;  %v3924_v47 = vsub.s32 2, %v3912_v41  ;;  %v43_v48 = vld [vmem:[%s4229_s7] sm:$0x3f]  ;;  %v1501_v49 = vrot.slane %v1496_v44, %v3918_v45  ;;  %v3931_v50 = vsub.s32 3, %v3912_v41  ;;  %v1505_v51 = vrot.slane %v1496_v44, %v3921_v46 }
 0x13b   :  { %1373 = vst [vmem:[#allocation3 + $0x38] sm:$0xc] %v1369_v54  ;;  %1463 = vst [vmem:[#allocation3 + $0x54] sm:$0x33] %v3058_v55  ;;  %v3935_v52 = vrot.slane %v43_v48, %v3918_v45  ;;  %v3939_v55 = vrot.slane %v43_v48, %v3921_v46 }
 0x13c   :  { %v1509_v53 = vrot.slane %v1496_v44, %v3924_v47 }
 0x145   :  { %v1149_v56 = vpop.f32.mrb[20].mxu0  ;;  %v1190_v57 = vpop.f32.mrb[20].mxu1 }
 0x146   :  { %v3146_v58 = vpack.c.bf16 %v1149_v56, %v1149_v56  ;;  %v1151_v59 = vpop.f32.mrb[21].mxu0  ;;  %v1192_v60 = vpop.f32.mrb[21].mxu1 }
 0x147   :  { %v3147_v19 = vpack.c.bf16 %v1190_v57, %v1151_v59  ;;  %v3148_v61 = vpack.c.bf16 %v1192_v60, %v1192_v60  ;;  %v1153_v62 = vpop.f32.mrb[22].mxu0  ;;  %v1194_v63 = vpop.f32.mrb[22].mxu1  ;;  %v1513_v59 = vrot.slane %v1496_v44, %v3931_v50 }
 0x148   :  { %1388 = vst [vmem:[#allocation3 + $0x50] sm:$0x3] %v3146_v58  ;;  %v3059_v0 = vrot.slane %v3146_v58, 10  ;;  %v1154_v1 = vpop.f32.mrb[23].mxu0  ;;  %v1195_v3 = vpop.f32.mrb[23].mxu1  ;;  %v3944_v58 = vrot.slane %v43_v48, %v3924_v47 }
 0x149   :  { %v1400_v4 = vrot.slane %v3147_v19, 6  ;;  %1467 = vst [vmem:[#allocation3 + $0x54] sm:$0xcc] %v3147_v19  ;;  %v1401_v5 = vrot.slane %v3148_v61, 6  ;;  %1468 = vst [vmem:[#allocation3 + $0x5c] sm:$0xc] %v3148_v61 }
 0x14a   :  { %1464 = vst [vmem:[#allocation3 + $0x5c] sm:$0x3] %v3059_v0 }
 0x14b   :  { %1404 = vst [vmem:[#allocation3 + $0x48] sm:$0xcc] %v1400_v4  ;;  %1405 = vst [vmem:[#allocation3 + $0x50] sm:$0xc] %v1401_v5  ;;  %v3956_v4 = vrot.slane %v43_v48, %v3931_v50 }
 0x150   :  { %v3351_v7 = vld [vmem:[#allocation3 + $0x3c] ss:$24 sps:$4 sm:$0xff]   ;;  %v3364_v36 = vld [vmem:[#allocation3 + $0x40] ss:$24 sps:$4 sm:$0xff]  }
 0x151   :  { %1669 = vmatprep.subr.bf16.mxu1 %v3351_v7  ;;  %v3362_v34 = vld [vmem:[#allocation3 + $0x44] ss:$24 sps:$4 sm:$0xff]  }
 0x152   :  { %v3349_v6 = vld [vmem:[#allocation3 + $0x34] ss:$24 sps:$4 sm:$0xff]   ;;  %v3353_v8 = vld [vmem:[#allocation3 + $0x30] ss:$24 sps:$4 sm:$0xff]  }
 0x153   :  { %v3354_v9 = vld [vmem:[#allocation3 + $0x38] ss:$24 sps:$4 sm:$0xff]   ;;  %1628 = vmatprep.subr.bf16.mxu0 %v3349_v6 }
 0x154   :  { %1629 = vmatpush1.bf16.msra.mxu0 %v3353_v8  ;;  %1670 = vmatpush1.bf16.msra.mxu1 %v3354_v9 }
 0x155   :  { %v1231_v10 = vpop.f32.mrb[24].mxu0  ;;  %v1272_v11 = vpop.f32.mrb[24].mxu1 }
 0x156   :  { %v1233_v12 = vpop.f32.mrb[25].mxu0  ;;  %v3150_v13 = vpack.c.bf16 %v1272_v11, %v1272_v11  ;;  %v3166_v14 = vpop.f32.mrb[25].mxu1 }
 0x157   :  { %v3149_v15 = vpack.c.bf16 %v1233_v12, %v1231_v10  ;;  %v1235_v16 = vpop.f32.mrb[26].mxu0  ;;  %v1275_v17 = vpop.f32.mrb[26].mxu1  ;;  %v3963_v10 = vsub.s32 4, %v3912_v41  ;;  %v3966_v12 = vsub.s32 5, %v3912_v41 }
 0x158   :  { %1420 = vst [vmem:[#allocation3 + $0x68] sm:$0x3] %v3150_v13  ;;  %v3061_v18 = vrot.slane %v3150_v13, 10  ;;  %v1236_v20 = vpop.f32.mrb[27].mxu0  ;;  %v3167_v21 = vpop.f32.mrb[27].mxu1 }
 0x159   :  { %1419 = vst [vmem:[#allocation3 + $0x60] sm:$0x33] %v3149_v15  ;;  %v3060_v22 = vrot.slane %v3149_v15, 10  ;;  %v1517_v17 = vrot.slane %v1496_v44, %v3963_v10  ;;  %v3973_v21 = vrot.slane %v43_v48, %v3963_v10 }
 0x15a   :  { %1476 = vst [vmem:[#allocation3 + $0x74] sm:$0x3] %v3061_v18  ;;  %v1521_v18 = vrot.slane %v1496_v44, %v3966_v12 }
 0x15b   :  { %1475 = vst [vmem:[#allocation3 + $0x6c] sm:$0x33] %v3060_v22 }
 0x160   :  { %v1490_v23 = vld [vmem:[#allocation3 + $0x60] sm:$0x33] }
 0x161   :  { %v3075_v24 = vcombine.high %v1490_v23, %v1490_v23  ;;  %v3074_v25 = vcombine.low %v1490_v23, %v1490_v23  ;;  %v3976_v23 = vrot.slane %v43_v48, %v3966_v12 }
 0x162   :  { %v1491_v26 = vld [vmem:[#allocation3 + $0x68] sm:$0x33]  ;;  %v1492_v35 = vld [vmem:[#allocation3 + $0x70] sm:$0x33] }
 0x163   :  { %3080 = vmatprep.subr.msk.bf16.mxu0 %vm1607_vm2, %v3075_v24  ;;  %v1609_v27 = vsel %vm1607_vm2, %v3074_v25, 0  ;;  %v3077_v28 = vcombine.high %v1491_v26, %v1491_v26  ;;  %v3076_v30 = vcombine.low %v1491_v26, %v1491_v26  ;;  %v3079_v37 = vcombine.high %v1492_v35, %v1492_v35 }
 0x164   :  { %1631 = vmatpush1.bf16.msra.mxu0 %v1609_v27  ;;  %v3078_v38 = vcombine.low %v1492_v35, %v1492_v35 }
 0x165   :  { %3082 = vmatprep.subr.msk.bf16.mxu1 %vm1607_vm2, %v3077_v28  ;;  %1708 = vmatprep.subr.bf16.mxu0 %v3358_v29  ;;  %v1615_v32 = vsel %vm1607_vm2, %v3076_v30, 0 }
 0x166   :  { %1672 = vmatpush1.bf16.msra.mxu1 %v1615_v32  ;;  %v1621_v39 = vsel %vm1607_vm2, %v3078_v38, 0 }
 0x167   :  { %3081 = vmatmul.mubr.msk.bf16.vlgmr.msra.gmra.mrb[28].mxu0 %vm1603_vm3, %v1477_v31 }
 0x168   :  { %1709 = vmatpush1.bf16.msra.mxu0 %v3361_v33  ;;  %1740 = vmatprep.mubr.bf16.mxu0 %v3463_v2 }
 0x169   :  { %1710 = vmatprep.subr.bf16.mxu0 %v3362_v34  ;;  %3083 = vmatmul.mubr.msk.bf16.vlgmr.msra.gmra.mrb[28].mxu1 %vm1603_vm3, %v1477_v31 }
 0x16a   :  { %2676 = vmatprep.mubr.bf16.mxu1 %v3463_v2 }
 0x16c   :  { %1711 = vmatpush1.bf16.msra.mxu0 %v3364_v36 }
 0x16d   :  { %3084 = vmatprep.subr.msk.bf16.mxu0 %vm1607_vm2, %v3079_v37 }
 0x170   :  { %1713 = vmatpush1.bf16.msra.mxu0 %v1621_v39 }
 0x173   :  { %3085 = vmatmul.mubr.msk.bf16.vlgmr.msra.gmra.mrb[32].mxu0 %vm1603_vm3, %v1477_v31 }
 0x174   :  { %2717 = vmatprep.mubr.bf16.mxu0 %v3463_v2 }
 0x23a   :  { %v1660_v54 = vpop.f32.mrb[28].mxu0 }
 0x23b   :  { %v3941_v56 = vadd.f32 %v1660_v54, %v1501_v49  ;;  %v1662_v57 = vpop.f32.mrb[29].mxu0  ;;  %v1812_v54 = vld [vmem:[%s4227_s5] sm:$0xff] }
 0x23c   :  { %v3947_v60 = vadd.f32 %v1662_v57, %v1505_v51  ;;  %v1664_v19 = vpop.f32.mrb[30].mxu0  ;;  %v1701_v61 = vpop.f32.mrb[28].mxu1 }
 0x23d   :  { %v1780_v62 = vmul.f32 %v3935_v52, %v3941_v56  ;;  %v1665_v63 = vpop.f32.mrb[31].mxu0  ;;  %v3951_v0 = vadd.f32 %v1701_v61, %v1509_v53  ;;  %v1703_v1 = vpop.f32.mrb[29].mxu1  ;;  %v3086_v19 = vld [vmem:[%s4227_s5 + $0x8] sm:$0xff] }
 0x23e   :  { %v1781_v3 = vmul.f32 %v3939_v55, %v3947_v60  ;;  %v1705_v5 = vpop.f32.mrb[30].mxu1  ;;  %v3960_v8 = vadd.f32 %v1703_v1, %v1513_v59 }
 0x23f   :  { %v1793_v6 = vmul.f32 %v1780_v62, %v1780_v62  ;;  %v1782_v7 = vmul.f32 %v3944_v58, %v3951_v0  ;;  %v1706_v9 = vpop.f32.mrb[31].mxu1 }
 0x240   :  { %v1794_v11 = vmul.f32 %v1781_v3, %v1781_v3  ;;  %v1786_v13 = vadd.f32 %v1781_v3, %v1780_v62  ;;  %v1783_v16 = vmul.f32 %v3956_v4, %v3960_v8 }
 0x241   :  { %v1795_v15 = vmul.f32 %v1782_v7, %v1782_v7 }
 0x242   :  { %v1799_v14 = vadd.f32 %v1794_v11, %v1793_v6  ;;  %v1787_v20 = vadd.f32 %v1786_v13, %v1782_v7  ;;  %v1796_v25 = vmul.f32 %v1783_v16, %v1783_v16 }
 0x244   :  { %v1800_v24 = vadd.f32 %v1799_v14, %v1795_v15  ;;  %v1788_v32 = vadd.f32 %v1787_v20, %v1783_v16 }
 0x246   :  { %v1742_v22 = vpop.f32.mrb[32].mxu0  ;;  %v1801_v36 = vadd.f32 %v1800_v24, %v1796_v25 }
 0x247   :  { %v1743_v26 = vadd.f32 %v1742_v22, %v1517_v17  ;;  %v1744_v27 = vpop.f32.mrb[33].mxu0 }
 0x248   :  { %v1745_v28 = vadd.f32 %v1744_v27, %v1521_v18  ;;  %v1746_v29 = vpop.f32.mrb[34].mxu0 }
 0x249   :  { %v1784_v30 = vmul.f32 %v3973_v21, %v1743_v26  ;;  %v1747_v31 = vpop.f32.mrb[35].mxu0 }
 0x24a   :  { %v1785_v33 = vmul.f32 %v3976_v23, %v1745_v28 }
 0x24b   :  { %v1797_v34 = vmul.f32 %v1784_v30, %v1784_v30  ;;  %v1789_v35 = vadd.f32 %v1788_v32, %v1784_v30 }
 0x24c   :  { %v1798_v38 = vmul.f32 %v1785_v33, %v1785_v33 }
 0x24d   :  { %v1790_v37 = vadd.f32 %v1789_v35, %v1785_v33  ;;  %v1802_v39 = vadd.f32 %v1801_v36, %v1797_v34 }
 0x24f   :  { %1791 = vadd.xlane.f32.xlu0 %v1790_v37  ;;  %v1803_v40 = vadd.f32 %v1802_v39, %v1798_v38 }
 0x253   :  { %1804 = vadd.xlane.f32.xlu0 %v1803_v40  ;;  %v3466_v40 = vmov 1983009808  }
 0x2dc   :  { %v1792_v42 = vpop.xlane.xlu0 %1791 }
 0x2dd   :  { %v1806_v43 = vmul.f32 0.001953125, %v1792_v42  ;;  %v1924_v42 = vunpack.c.l.s4 %v3466_v40 }
 0x2df   :  { %v1808_v48 = vmul.f32 %v1806_v43, %v1806_v43  ;;  %v1814_v62 = vsub.f32 %v3941_v56, %v1806_v43  ;;  %v1815_v63 = vsub.f32 %v3947_v60, %v1806_v43  ;;  %v1816_v1 = vsub.f32 %v3951_v0, %v1806_v43 }
 0x2e0   :  { %v1805_v44 = vpop.xlane.xlu0 %1804  ;;  %v1817_v3 = vsub.f32 %v3960_v8, %v1806_v43  ;;  %v1818_v5 = vsub.f32 %v1743_v26, %v1806_v43  ;;  %v1819_v6 = vsub.f32 %v1745_v28, %v1806_v43 }
 0x2e1   :  { %v1807_v49 = vmul.f32 0.001953125, %v1805_v44 }
 0x2e3   :  { %v1809_v51 = vsub.f32 %v1807_v49, %v1808_v48 }
 0x2e5   :  { %v1810_v53 = vadd.f32 1e-05, %v1809_v51  ;;  %v1925_v51 = vunpack.c.0.s8 %v1924_v42 }
 0x2e7   :  { %3396 = vrsqrt.f32 %v1810_v53 }
 0x2f1   :  { %v3397_v57 = vpop.eup %3396 }
 0x2f2   :  { %v1813_v59 = vmul.f32 %v3397_v57, %v1812_v54 }
 0x2f4   :  { %1822 = vperm.xlu1 %3181, %v1813_v59  }
 0x2f8   :  { %1835 = vperm.xlu1 %3181, %v3086_v19  }
 0x373   :  { %v1823_v61 = vpop.permute.xlu1 %1822 }
 0x374   :  { %v1825_v7 = vmul.f32 %v1823_v61, %v1814_v62  ;;  %v1826_v9 = vmul.f32 %v1823_v61, %v1815_v63  ;;  %v1827_v11 = vmul.f32 %v1823_v61, %v1816_v1  ;;  %v1828_v13 = vmul.f32 %v1823_v61, %v1817_v3 }
 0x375   :  { %v1829_v14 = vmul.f32 %v1823_v61, %v1818_v5  ;;  %v1830_v15 = vmul.f32 %v1823_v61, %v1819_v6  ;;  %v3996_v6 = vsub.s32 %v1925_v51, %v3912_v41 }
 0x377   :  { %v1836_v16 = vpop.permute.xlu1 %1835 }
 0x378   :  { %v1838_v17 = vadd.f32 %v1836_v16, %v1825_v7  ;;  %v1839_v18 = vadd.f32 %v1836_v16, %v1826_v9  ;;  %v1840_v20 = vadd.f32 %v1836_v16, %v1827_v11  ;;  %v1841_v22 = vadd.f32 %v1836_v16, %v1828_v13 }
 0x379   :  { %v1842_v56 = vadd.f32 %v1836_v16, %v1829_v14  ;;  %v1843_v24 = vadd.f32 %v1836_v16, %v1830_v15 }
 0x37a   :  { %v3087_v60 = vmul.f32 -1.442695, %v1838_v17  ;;  %v3088_v25 = vmul.f32 -1.442695, %v1839_v18  ;;  %v3089_v0 = vmul.f32 -1.442695, %v1840_v20 }
 0x37b   :  { %v3090_v27 = vmul.f32 -1.442695, %v1841_v22  ;;  %v3091_v8 = vmul.f32 -1.442695, %v1842_v56  ;;  %v3092_v26 = vmul.f32 -1.442695, %v1843_v24 }
 0x37c   :  { %3398 = vpow2.f32 %v3087_v60 }
 0x37d   :  { %3400 = vpow2.f32 %v3088_v25 }
 0x37e   :  { %3402 = vpow2.f32 %v3089_v0 }
 0x37f   :  { %3404 = vpow2.f32 %v3090_v27 }
 0x380   :  { %3406 = vpow2.f32 %v3091_v8 }
 0x381   :  { %3408 = vpow2.f32 %v3092_v26 }
 0x386   :  { %v3399_v28 = vpop.eup %3398 }
 0x387   :  { %v3401_v29 = vpop.eup %3400  ;;  %v1862_v30 = vadd.f32 1.0, %v3399_v28 }
 0x388   :  { %v3403_v31 = vpop.eup %3402  ;;  %v1863_v32 = vadd.f32 1.0, %v3401_v29 }
 0x389   :  { %v3405_v33 = vpop.eup %3404  ;;  %v1864_v34 = vadd.f32 1.0, %v3403_v31  ;;  %3410 = vrcp.f32 %v1862_v30 }
 0x38a   :  { %v3407_v35 = vpop.eup %3406  ;;  %v1865_v36 = vadd.f32 1.0, %v3405_v33  ;;  %3412 = vrcp.f32 %v1863_v32 }
 0x38b   :  { %v3409_v37 = vpop.eup %3408  ;;  %v1866_v38 = vadd.f32 1.0, %v3407_v35  ;;  %3414 = vrcp.f32 %v1864_v34 }
 0x38c   :  { %v1867_v39 = vadd.f32 1.0, %v3409_v37  ;;  %3416 = vrcp.f32 %v1865_v36 }
 0x38d   :  { %3418 = vrcp.f32 %v1866_v38 }
 0x38e   :  { %3420 = vrcp.f32 %v1867_v39 }
 0x393   :  { %v3411_v43 = vpop.eup %3410 }
 0x394   :  { %v3413_v44 = vpop.eup %3412  ;;  %v1886_v48 = vrot.slane %v3411_v43, 4 }
 0x395   :  { %v3415_v49 = vpop.eup %3414  ;;  %v1887_v53 = vrot.slane %v3413_v44, 4 }
 0x396   :  { %v3417_v54 = vpop.eup %3416  ;;  %v1888_v57 = vrot.slane %v3415_v49, 4  ;;  %v1898_v59 = vmul.f32 %v1886_v48, %v1838_v17 }
 0x397   :  { %v3419_v19 = vpop.eup %3418  ;;  %v1889_v61 = vrot.slane %v3417_v54, 4  ;;  %v1899_v62 = vmul.f32 %v1887_v53, %v1839_v18 }
 0x398   :  { %v3421_v63 = vpop.eup %3420  ;;  %v1890_v1 = vrot.slane %v3419_v19, 4  ;;  %v1900_v3 = vmul.f32 %v1888_v57, %v1840_v20  ;;  %v1910_v5 = vmul.f32 %v1898_v59, %v3935_v52 }
 0x399   :  { %v1891_v7 = vrot.slane %v3421_v63, 4  ;;  %v1901_v9 = vmul.f32 %v1889_v61, %v1841_v22  ;;  %v1911_v11 = vmul.f32 %v1899_v62, %v3939_v55 }
 0x39a   :  { %v1902_v13 = vmul.f32 %v1890_v1, %v1842_v56  ;;  %v1912_v14 = vmul.f32 %v1900_v3, %v3944_v58 }
 0x39b   :  { %v1903_v15 = vmul.f32 %v1891_v7, %v1843_v24  ;;  %v1913_v16 = vmul.f32 %v1901_v9, %v3956_v4  ;;  %v3093_v17 = vpack.c.bf16 %v1911_v11, %v1910_v5 }
 0x39c   :  { %v1914_v18 = vmul.f32 %v1902_v13, %v3973_v21  ;;  %v1918_v60 = vpack.c.bf16 %v1912_v14, %v1912_v14 }
 0x39d   :  { %v1915_v20 = vmul.f32 %v1903_v15, %v3976_v23  ;;  %v1929_v25 = vrot.slane %v3093_v17, %v3996_v6 }
 0x39e   :  { %v1936_v41 = vrot.slane %v1918_v60, %v3996_v6  ;;  %v3094_v0 = vpack.c.bf16 %v1914_v18, %v1913_v16 }
 0x39f   :  { %v1942_v22 = vpack.c.bf16 %v1915_v20, %v1915_v20 }
 0x3a0   :  { %v1937_v27 = vcombine.low %v1929_v25, %v1936_v41  ;;  %v1953_v56 = vrot.slane %v3094_v0, %v3996_v6 }
 0x3a1   :  { %v1960_v8 = vrot.slane %v1942_v22, %v3996_v6 }
 0x3a2   :  { %1939 = vst [vmem:[#allocation2 + $0x2] sm:$0x3f] %v1937_v27 }
 0x3a3   :  { %v1961_v24 = vcombine.low %v1953_v56, %v1960_v8 }
 0x3a5   :  { %1964 = vst [vmem:[#allocation2 + $0xc] sm:$0x3f] %v1961_v24 }
 0x3a9   :  { %v1997_v26 = vld [vmem:[#allocation2] sm:$0xff] }
 0x3aa   :  { %v2090_v28 = vld [vmem:[#allocation2 + $0x2] sm:$0x3f]  ;;  %v2013_v29 = vrot.slane %v1997_v26, %v3996_v6  ;;  %v1967_v39 = vcombine.high %v1997_v26, %v1997_v26  ;;  %v1999_v43 = vcombine.low %v1997_v26, %v1997_v26 }
 0x3ab   :  { %3095 = vst.sshfl [vmem:[#allocation3 + $0x30] sm:$0xf pattern:$0x76325410] %v2090_v28  ;;  %v2092_v30 = vcombine.high %v2090_v28, %v2090_v28  ;;  %v2142_v32 = vld [vmem:[#allocation2 + $0x2] sm:$0xff] }
 0x3ac   :  { %2016 = vrot.lane.b32.xlu1 %v2013_v29, %s3467_s20  ;;  %1982 = vrot.lane.b32.xlu0 %v2013_v29, %s3468_s21  ;;  %v2355_v31 = vld [vmem:[#allocation2 + $0xc] sm:$0x3f]  ;;  %v2151_v34 = vrot.slane %v2142_v32, %v3996_v6  ;;  %v1981_v40 = vrot.slane %v1967_v39, %v3996_v6  ;;  %v2144_v42 = vcombine.high %v2142_v32, %v2142_v32 }
 0x3ad   :  { %3096 = vst.sshfl [vmem:[#allocation3 + $0x38] sm:$0x3 pattern:$0x76325410] %v2092_v30  ;;  %v2357_v33 = vcombine.high %v2355_v31, %v2355_v31  ;;  %v2235_v35 = vld [vmem:[#allocation2 + $0xa] sm:$0xff]  ;;  %v2006_v48 = vrot.slane %v1999_v43, %v3996_v6  ;;  %v2113_v53 = vcombine.low %v2142_v32, %v2142_v32 }
 0x3ae   :  { %3097 = vst.sshfl [vmem:[#allocation3 + $0x3c] sm:$0xf pattern:$0x76325410] %v2355_v31  ;;  %v2244_v36 = vrot.slane %v2235_v35, %v3996_v6  ;;  %v2406_v37 = vld [vmem:[#allocation2 + $0xc] sm:$0xff]  ;;  %v2158_v44 = vrot.slane %v2144_v42, %v3996_v6  ;;  %v2237_v49 = vcombine.high %v2235_v35, %v2235_v35  ;;  %v2267_v19 = vcombine.low %v2235_v35, %v2235_v35 }
 0x3af   :  { %3098 = vst.sshfl [vmem:[#allocation3 + $0x44] sm:$0x3 pattern:$0x76325410] %v2357_v33  ;;  %v2415_v38 = vrot.slane %v2406_v37, %v3996_v6  ;;  %v2120_v54 = vrot.slane %v2113_v53, %v3996_v6  ;;  %v2408_v57 = vcombine.high %v2406_v37, %v2406_v37  ;;  %v2378_v62 = vcombine.low %v2406_v37, %v2406_v37 }
 0x3b0   :  { %2045 = vrot.lane.b32.xlu1 %v2013_v29, %s3469_s22  ;;  %2078 = vrot.lane.b32.xlu0 %v2013_v29, %s3470_s23  ;;  %v2251_v51 = vrot.slane %v2237_v49, %v3996_v6  ;;  %v2274_v61 = vrot.slane %v2267_v19, %v3996_v6 }
 0x3b1   :  { %v2422_v59 = vrot.slane %v2408_v57, %v3996_v6  ;;  %v2385_v63 = vrot.slane %v2378_v62, %v3996_v6 }
 0x3b4   :  { %2159 = vrot.lane.b32.xlu1 %v2151_v34, %s3471_s24  ;;  %2130 = vrot.lane.b32.xlu0 %v2151_v34, %s3472_s25 }
 0x3b8   :  { %2221 = vrot.lane.b32.xlu1 %v2151_v34, %s3473_s26  ;;  %2192 = vrot.lane.b32.xlu0 %v2151_v34, %s3474_s27 }
 0x3bc   :  { %2252 = vrot.lane.b32.xlu1 %v2244_v36, %s3468_s21  ;;  %2284 = vrot.lane.b32.xlu0 %v2244_v36, %s3467_s20 }
 0x3c0   :  { %2312 = vrot.lane.b32.xlu1 %v2244_v36, %s3469_s22  ;;  %2344 = vrot.lane.b32.xlu0 %v2244_v36, %s3470_s23 }
 0x3c4   :  { %2423 = vrot.lane.b32.xlu1 %v2415_v38, %s3471_s24  ;;  %2395 = vrot.lane.b32.xlu0 %v2415_v38, %s3472_s25 }
 0x3c8   :  { %2455 = vrot.lane.b32.xlu0 %v2415_v38, %s3474_s27  ;;  %1984 = vrot.lane.b32.xlu1 %v1981_v40, %s3468_s21 }
 0x3cc   :  { %2161 = vrot.lane.b32.xlu0 %v2158_v44, %s3471_s24  ;;  %2014 = vrot.lane.b32.xlu1 %v2006_v48, %s3467_s20 }
 0x3d0   :  { %2223 = vrot.lane.b32.xlu0 %v2158_v44, %s3473_s26  ;;  %2047 = vrot.lane.b32.xlu1 %v1981_v40, %s3469_s22 }
 0x3d4   :  { %2254 = vrot.lane.b32.xlu0 %v2251_v51, %s3468_s21  ;;  %2076 = vrot.lane.b32.xlu1 %v2006_v48, %s3470_s23 }
 0x3d8   :  { %2314 = vrot.lane.b32.xlu0 %v2251_v51, %s3469_s22  ;;  %2128 = vrot.lane.b32.xlu1 %v2120_v54, %s3472_s25 }
 0x3dc   :  { %2425 = vrot.lane.b32.xlu0 %v2422_v59, %s3471_s24  ;;  %2190 = vrot.lane.b32.xlu1 %v2120_v54, %s3474_s27 }
 0x3e0   :  { %2485 = vrot.lane.b32.xlu0 %v2422_v59, %s3473_s26  ;;  %2282 = vrot.lane.b32.xlu1 %v2274_v61, %s3467_s20 }
 0x3e4   :  { %2342 = vrot.lane.b32.xlu1 %v2274_v61, %s3470_s23 }
 0x3e8   :  { %2393 = vrot.lane.b32.xlu1 %v2385_v63, %s3472_s25 }
 0x3ec   :  { %2453 = vrot.lane.b32.xlu1 %v2385_v63, %s3474_s27 }
 0x3f0   :  { %2483 = vrot.lane.b32.xlu1 %v2415_v38, %s3473_s26 }
 0x41e   :  { %v2017_v1 = vpop.permute.xlu1 %2016  ;;  %v1983_v3 = vpop.permute.xlu0 %1982 }
 0x41f   :  { %v2019_v5 = vrot.slane %v2017_v1, 4  ;;  %v1986_v34 = vrot.slane %v1983_v3, 4 }
 0x421   :  { %v2023_v7 = vsel %vm2021_vm6, %v2017_v1, %v2019_v5 }
 0x422   :  { %2027 = vst [vmem:[#allocation3 + $0x8] sm:$0xc] %v2023_v7  ;;  %v4052_v9 = vpop.permute.xlu1 %2045  ;;  %v4054_v11 = vpop.permute.xlu0 %2078 }
 0x423   :  { %v2081_v6 = vrot.slane %v4054_v11, 4  ;;  %v2049_v62 = vrot.slane %v4052_v9, 4 }
 0x425   :  { %v2085_v13 = vsel %vm2083_vm7, %v4054_v11, %v2081_v6 }
 0x426   :  { %2089 = vst [vmem:[#allocation3 + $0x20] sm:$0xc] %v2085_v13  ;;  %v2160_v14 = vpop.permute.xlu1 %2159  ;;  %v4061_v15 = vpop.permute.xlu0 %2130 }
 0x427   :  { %v2133_v16 = vrot.slane %v4061_v15, 4  ;;  %v2163_v44 = vrot.slane %v2160_v14, 4 }
 0x429   :  { %v2137_v17 = vsel %vm2135_vm8, %v4061_v15, %v2133_v16 }
 0x42a   :  { %2141 = vst [vmem:[#allocation3 + $0x38] sm:$0xc] %v2137_v17  ;;  %v2222_v18 = vpop.permute.xlu1 %2221  ;;  %v4068_v60 = vpop.permute.xlu0 %2192 }
 0x42b   :  { %v2195_v20 = vrot.slane %v4068_v60, 4  ;;  %v2225_v63 = vrot.slane %v2222_v18, 4 }
 0x42d   :  { %v2199_v25 = vsel %vm2197_vm9, %v4068_v60, %v2195_v20 }
 0x42e   :  { %2203 = vst [vmem:[#allocation3 + $0x50] sm:$0xc] %v2199_v25  ;;  %v4075_v41 = vpop.permute.xlu1 %2252  ;;  %v4077_v0 = vpop.permute.xlu0 %2284 }
 0x42f   :  { %v2287_v22 = vrot.slane %v4077_v0, 4 }
 0x431   :  { %v2290_v27 = vsel %vm2021_vm6, %v4077_v0, %v2287_v22 }
 0x432   :  { %2294 = vst [vmem:[#allocation3 + $0x14] sm:$0xc] %v2290_v27  ;;  %v4084_v56 = vpop.permute.xlu1 %2312  ;;  %v4086_v8 = vpop.permute.xlu0 %2344 }
 0x433   :  { %v2347_v24 = vrot.slane %v4086_v8, 4 }
 0x435   :  { %v2350_v26 = vsel %vm2083_vm7, %v4086_v8, %v2347_v24 }
 0x436   :  { %2354 = vst [vmem:[#allocation3 + $0x2c] sm:$0xc] %v2350_v26  ;;  %v4093_v28 = vpop.permute.xlu1 %2423  ;;  %v4095_v29 = vpop.permute.xlu0 %2395 }
 0x437   :  { %v2398_v30 = vrot.slane %v4095_v29, 4 }
 0x439   :  { %v2401_v31 = vsel %vm2135_vm8, %v4095_v29, %v2398_v30  ;;  %v2496_v29 = vld [vmem:[%s4226_s4] sm:$0xf]  ;;  %s3099_s4 = sld [smem:[#allocation4 + $0x1]] }
 0x43a   :  { %2405 = vst [vmem:[#allocation3 + $0x44] sm:$0xc] %v2401_v31  ;;  %v4102_v32 = vpop.permute.xlu0 %2455  ;;  %v1985_v33 = vpop.permute.xlu1 %1984  ;;  %v2256_v31 = vrot.slane %v4075_v41, 4 }
 0x43b   :  { %v2458_v35 = vrot.slane %v4102_v32, 4  ;;  %v1987_v36 = vrot.slane %v1985_v33, 4 }
 0x43d   :  { %v2461_v37 = vsel %vm2197_vm9, %v4102_v32, %v2458_v35  ;;  %v1989_v38 = vsel %vm1988_vm10, %v1986_v34, %v1987_v36  ;;  %v1992_v39 = vsel %vm1990_vm11, %v1985_v33, %v1987_v36 }
 0x43e   :  { %2465 = vst [vmem:[#allocation3 + $0x5c] sm:$0xc] %v2461_v37  ;;  %v1991_v40 = vsel %vm1990_vm11, %v1983_v3, %v1989_v38  ;;  %1996 = vst [vmem:[#allocation3 + $0x8] sm:$0x3] %v1992_v39  ;;  %v2162_v42 = vpop.permute.xlu0 %2161  ;;  %v2015_v43 = vpop.permute.xlu1 %2014 }
 0x43f   :  { %1995 = vst [vmem:[#allocation3] sm:$0x33] %v1991_v40  ;;  %v2164_v48 = vrot.slane %v2162_v42, 4  ;;  %v2018_v49 = vrot.slane %v2015_v43, 4 }
 0x441   :  { %v2165_v51 = vsel %vm1988_vm10, %v2163_v44, %v2164_v48  ;;  %v2168_v53 = vsel %vm2166_vm12, %v2162_v42, %v2164_v48  ;;  %v2020_v54 = vsel %vm1988_vm10, %v2018_v49, %v2019_v5  ;;  %v2316_v42 = vrot.slane %v4084_v56, 4 }
 0x442   :  { %v2167_v57 = vsel %vm2166_vm12, %v2160_v14, %v2165_v51  ;;  %2172 = vst [vmem:[#allocation3 + $0x50] sm:$0x3] %v2168_v53  ;;  %v2022_v59 = vsel %vm2021_vm6, %v2015_v43, %v2020_v54  ;;  %v2224_v19 = vpop.permute.xlu0 %2223  ;;  %v2048_v61 = vpop.permute.xlu1 %2047  ;;  %v2427_v54 = vrot.slane %v4093_v28, 4 }
 0x443   :  { %2171 = vst [vmem:[#allocation3 + $0x48] sm:$0x33] %v2167_v57  ;;  %2026 = vst [vmem:[#allocation3] sm:$0xcc] %v2022_v59  ;;  %v2226_v1 = vrot.slane %v2224_v19, 4  ;;  %v2050_v3 = vrot.slane %v2048_v61, 4 }
 0x445   :  { %v2227_v7 = vsel %vm1988_vm10, %v2225_v63, %v2226_v1  ;;  %v2230_v5 = vsel %vm2228_vm13, %v2224_v19, %v2226_v1  ;;  %v2051_v13 = vsel %vm1988_vm10, %v2049_v62, %v2050_v3  ;;  %v2054_v14 = vsel %vm2052_vm14, %v2048_v61, %v2050_v3 }
 0x446   :  { %v2229_v17 = vsel %vm2228_vm13, %v2222_v18, %v2227_v7  ;;  %2234 = vst [vmem:[#allocation3 + $0x68] sm:$0x3] %v2230_v5  ;;  %v2053_v25 = vsel %vm2052_vm14, %v4052_v9, %v2051_v13  ;;  %2058 = vst [vmem:[#allocation3 + $0x20] sm:$0x3] %v2054_v14  ;;  %v2255_v27 = vpop.permute.xlu0 %2254  ;;  %v2077_v26 = vpop.permute.xlu1 %2076 }
 0x447   :  { %2233 = vst [vmem:[#allocation3 + $0x60] sm:$0x33] %v2229_v17  ;;  %2057 = vst [vmem:[#allocation3 + $0x18] sm:$0x33] %v2053_v25  ;;  %v2257_v33 = vrot.slane %v2255_v27, 4  ;;  %v2080_v34 = vrot.slane %v2077_v26, 4 }
 0x449   :  { %v2258_v36 = vsel %vm1988_vm10, %v2256_v31, %v2257_v33  ;;  %v2260_v37 = vsel %vm1990_vm11, %v2255_v27, %v2257_v33  ;;  %v2082_v18 = vsel %vm1988_vm10, %v2080_v34, %v2081_v6 }
 0x44a   :  { %v2259_v9 = vsel %vm1990_vm11, %v4075_v41, %v2258_v36  ;;  %2264 = vst [vmem:[#allocation3 + $0x14] sm:$0x3] %v2260_v37  ;;  %v2084_v38 = vsel %vm2083_vm7, %v2077_v26, %v2082_v18  ;;  %v2315_v39 = vpop.permute.xlu0 %2314  ;;  %v2129_v40 = vpop.permute.xlu1 %2128 }
 0x44b   :  { %2263 = vst [vmem:[#allocation3 + $0xc] sm:$0x33] %v2259_v9  ;;  %2088 = vst [vmem:[#allocation3 + $0x18] sm:$0xcc] %v2084_v38  ;;  %v2317_v43 = vrot.slane %v2315_v39, 4  ;;  %v2132_v44 = vrot.slane %v2129_v40, 4 }
 0x44d   :  { %v2318_v48 = vsel %vm1988_vm10, %v2316_v42, %v2317_v43  ;;  %v2320_v11 = vsel %vm2052_vm14, %v2315_v39, %v2317_v43  ;;  %v2134_v6 = vsel %vm1988_vm10, %v2132_v44, %v2133_v16  ;;  %v3380_v39 = vld [vmem:[#allocation3 + $0x8] ss:$24 sps:$4 sm:$0xff]  }
 0x44e   :  { %v2319_v41 = vsel %vm2052_vm14, %v4084_v56, %v2318_v48  ;;  %2324 = vst [vmem:[#allocation3 + $0x2c] sm:$0x3] %v2320_v11  ;;  %v2136_v49 = vsel %vm2135_vm8, %v2129_v40, %v2134_v6  ;;  %v2426_v51 = vpop.permute.xlu0 %2425  ;;  %v2191_v53 = vpop.permute.xlu1 %2190  ;;  %v2509_v25 = vld [vmem:[#allocation3 + $0x60] sm:$0x33]  ;;  %v3386_v48 = vld [vmem:[#allocation3 + $0x38] ss:$24 sps:$4 sm:$0xff]  }
 0x44f   :  { %2323 = vst [vmem:[#allocation3 + $0x24] sm:$0x33] %v2319_v41  ;;  %2140 = vst [vmem:[#allocation3 + $0x30] sm:$0xcc] %v2136_v49  ;;  %v2428_v57 = vrot.slane %v2426_v51, 4  ;;  %v2194_v59 = vrot.slane %v2191_v53, 4  ;;  %v3113_v34 = vcombine.low %v2509_v25, %v2509_v25 }
 0x451   :  { %v2429_v19 = vsel %vm1988_vm10, %v2427_v54, %v2428_v57  ;;  %v2431_v15 = vsel %vm2166_vm12, %v2426_v51, %v2428_v57  ;;  %v2196_v16 = vsel %vm1988_vm10, %v2194_v59, %v2195_v20  ;;  %v2627_v18 = vsel %vm1607_vm2, %v3113_v34, 0 }
 0x452   :  { %v2430_v56 = vsel %vm2166_vm12, %v4093_v28, %v2429_v19  ;;  %2435 = vst [vmem:[#allocation3 + $0x5c] sm:$0x3] %v2431_v15  ;;  %v2198_v61 = vsel %vm2197_vm9, %v2191_v53, %v2196_v16  ;;  %v2486_v62 = vpop.permute.xlu0 %2485  ;;  %v2283_v63 = vpop.permute.xlu1 %2282  ;;  %v3371_v1 = vld [vmem:[#allocation3] ss:$24 sps:$4 sm:$0xff]   ;;  %v3373_v3 = vld [vmem:[#allocation3 + $0x4] ss:$24 sps:$4 sm:$0xff]   ;;  %v2515_v16 = vstv %s3099_s4 }
 0x453   :  { %2434 = vst [vmem:[#allocation3 + $0x54] sm:$0x33] %v2430_v56  ;;  %2202 = vst [vmem:[#allocation3 + $0x48] sm:$0xcc] %v2198_v61  ;;  %v2488_v7 = vrot.slane %v2486_v62, 4  ;;  %v2286_v5 = vrot.slane %v2283_v63, 4  ;;  %2644 = vmatprep.subr.bf16.mxu1 %v3373_v3 }
 0x454   :  { %2645 = vmatpush1.bf16.msra.mxu1 %v3371_v1  ;;  %v3100_v15 = vld [vmem:[%s4228_s6 + $0x6] sm:$0x3f] }
 0x455   :  { %v2491_v13 = vsel %vm2228_vm13, %v2486_v62, %v2488_v7  ;;  %v2288_v60 = vsel %vm1988_vm10, %v2286_v5, %v2287_v22  ;;  %v3114_v22 = vcombine.high %v2509_v25, %v2509_v25  ;;  %v3385_v44 = vld [vmem:[#allocation3 + $0x14] ss:$24 sps:$4 sm:$0xff]   ;;  %v2516_v62 = vmul.f32 %v3100_v15, %v2515_v16 }
 0x456   :  { %2495 = vst [vmem:[#allocation3 + $0x74] sm:$0x3] %v2491_v13  ;;  %v2289_v20 = vsel %vm2021_vm6, %v2283_v63, %v2288_v60  ;;  %v2343_v28 = vpop.permute.xlu1 %2342 }
 0x457   :  { %2293 = vst [vmem:[#allocation3 + $0xc] sm:$0xcc] %v2289_v20  ;;  %v2346_v14 = vrot.slane %v2343_v28, 4  ;;  %v2521_v3 = vrot.slane %v2516_v62, %v3918_v45  ;;  %v2541_v45 = vrot.slane %v2516_v62, %v3966_v12 }
 0x459   :  { %v2348_v17 = vsel %vm1988_vm10, %v2346_v14, %v2347_v24  ;;  %v3391_v41 = vld [vmem:[#allocation3 + $0x44] ss:$24 sps:$4 sm:$0xff]   ;;  %v2537_v14 = vrot.slane %v2516_v62, %v3963_v10 }
 0x45a   :  { %v2349_v27 = vsel %vm2083_vm7, %v2343_v28, %v2348_v17  ;;  %v2394_v26 = vpop.permute.xlu1 %2393  ;;  %v3375_v31 = vld [vmem:[#allocation3 + $0x30] ss:$24 sps:$4 sm:$0xff]   ;;  %v3377_v33 = vld [vmem:[#allocation3 + $0x34] ss:$24 sps:$4 sm:$0xff]   ;;  %v2529_v28 = vrot.slane %v2516_v62, %v3924_v47  ;;  %v2533_v17 = vrot.slane %v2516_v62, %v3931_v50 }
 0x45b   :  { %2353 = vst [vmem:[#allocation3 + $0x24] sm:$0xcc] %v2349_v27  ;;  %v2397_v0 = vrot.slane %v2394_v26, 4  ;;  %2646 = vmatprep.subr.bf16.mxu1 %v3377_v33 }
 0x45c   :  { %2647 = vmatpush1.bf16.msra.mxu1 %v3375_v31 }
 0x45d   :  { %v2399_v36 = vsel %vm1988_vm10, %v2397_v0, %v2398_v30  ;;  %3119 = vmatprep.subr.msk.bf16.mxu1 %vm1607_vm2, %v3114_v22 }
 0x45e   :  { %v2400_v8 = vsel %vm2135_vm8, %v2394_v26, %v2399_v36  ;;  %v2454_v37 = vpop.permute.xlu1 %2453 }
 0x45f   :  { %2404 = vst [vmem:[#allocation3 + $0x3c] sm:$0xcc] %v2400_v8  ;;  %v2457_v24 = vrot.slane %v2454_v37, 4 }
 0x460   :  { %2649 = vmatpush1.bf16.msra.mxu1 %v2627_v18 }
 0x461   :  { %v2459_v9 = vsel %vm1988_vm10, %v2457_v24, %v2458_v35  ;;  %2726 = vmatprep.subr.bf16.mxu1 %v3385_v44 }
 0x462   :  { %v2460_v30 = vsel %vm2197_vm9, %v2454_v37, %v2459_v9  ;;  %v2484_v38 = vpop.permute.xlu1 %2483  ;;  %v3382_v40 = vld [vmem:[#allocation3 + $0xc] ss:$24 sps:$4 sm:$0xff]   ;;  %v3383_v43 = vld [vmem:[#allocation3 + $0x10] ss:$24 sps:$4 sm:$0xff]  }
 0x463   :  { %2464 = vst [vmem:[#allocation3 + $0x54] sm:$0xcc] %v2460_v30  ;;  %v2487_v42 = vrot.slane %v2484_v38, 4  ;;  %2685 = vmatprep.subr.bf16.mxu0 %v3382_v40  ;;  %3120 = vmatmul.mubr.msk.bf16.vlgmr.msra.gmra.mrb[32].mxu1 %vm1603_vm3, %v2496_v29 }
 0x464   :  { %2686 = vmatpush1.bf16.msra.mxu0 %v3380_v39  ;;  %2727 = vmatpush1.bf16.msra.mxu1 %v3383_v43 }
 0x465   :  { %v2489_v32 = vsel %vm1988_vm10, %v2487_v42, %v2488_v7  ;;  %2758 = vmatprep.mubr.bf16.mxu1 %v3463_v2  ;;  %2728 = vmatprep.subr.bf16.mxu1 %v3391_v41  ;;  %v2525_v7 = vrot.slane %v2516_v62, %v3921_v46 }
 0x466   :  { %v2490_v35 = vsel %vm2228_vm13, %v2484_v38, %v2489_v32 }
 0x467   :  { %2494 = vst [vmem:[#allocation3 + $0x6c] sm:$0x33] %v2490_v35 }
 0x46a   :  { %v3388_v11 = vld [vmem:[#allocation3 + $0x3c] ss:$24 sps:$4 sm:$0xff]   ;;  %v3389_v6 = vld [vmem:[#allocation3 + $0x40] ss:$24 sps:$4 sm:$0xff]  }
 0x46b   :  { %2687 = vmatprep.subr.bf16.mxu0 %v3388_v11  ;;  %2729 = vmatpush1.bf16.msra.mxu1 %v3389_v6 }
 0x46c   :  { %2688 = vmatpush1.bf16.msra.mxu0 %v3386_v48 }
 0x46e   :  { %v2510_v49 = vld [vmem:[#allocation3 + $0x68] sm:$0x33]  ;;  %v2511_v51 = vld [vmem:[#allocation3 + $0x70] sm:$0x33] }
 0x46f   :  { %v3116_v53 = vcombine.high %v2510_v49, %v2510_v49  ;;  %v3118_v54 = vcombine.high %v2511_v51, %v2511_v51  ;;  %v3115_v57 = vcombine.low %v2510_v49, %v2510_v49  ;;  %v3117_v59 = vcombine.low %v2511_v51, %v2511_v51  ;;  %v3125_v51 = vld [vmem:[%s4227_s5 + $0x10] sm:$0xff] }
 0x471   :  { %3121 = vmatprep.subr.msk.bf16.mxu0 %vm1607_vm2, %v3116_v53  ;;  %3123 = vmatprep.subr.msk.bf16.mxu1 %vm1607_vm2, %v3118_v54  ;;  %v2633_v2 = vsel %vm1607_vm2, %v3115_v57, 0  ;;  %v2639_v19 = vsel %vm1607_vm2, %v3117_v59, 0 }
 0x472   :  { %2690 = vmatpush1.bf16.msra.mxu0 %v2633_v2  ;;  %2731 = vmatpush1.bf16.msra.mxu1 %v2639_v19 }
 0x475   :  { %3122 = vmatmul.mubr.msk.bf16.vlgmr.msra.gmra.mrb[36].mxu0 %vm1603_vm3, %v2496_v29  ;;  %3124 = vmatmul.mubr.msk.bf16.vlgmr.msra.gmra.mrb[36].mxu1 %vm1603_vm3, %v2496_v29 }
 0x536   :  { %v2678_v56 = vpop.f32.mrb[32].mxu1 }
 0x537   :  { %v2680_v61 = vpop.f32.mrb[33].mxu1  ;;  %v4189_v5 = vadd.f32 %v2678_v56, %v2521_v3 }
 0x538   :  { %v2682_v63 = vpop.f32.mrb[34].mxu1  ;;  %v4191_v13 = vadd.f32 %v2680_v61, %v2525_v7 }
 0x539   :  { %v2683_v1 = vpop.f32.mrb[35].mxu1  ;;  %v2767_v60 = vmul.f32 %v4189_v5, %v3935_v52 }
 0x53a   :  { %v2768_v20 = vmul.f32 %v4191_v13, %v3939_v55 }
 0x53b   :  { %v2780_v27 = vmul.f32 %v2767_v60, %v2767_v60 }
 0x53c   :  { %v2781_v26 = vmul.f32 %v2768_v20, %v2768_v20  ;;  %v2773_v55 = vadd.f32 %v2768_v20, %v2767_v60 }
 0x53e   :  { %v2786_v24 = vadd.f32 %v2781_v26, %v2780_v27 }
 0x548   :  { %v2719_v25 = vpop.f32.mrb[36].mxu0  ;;  %v2760_v46 = vpop.f32.mrb[36].mxu1 }
 0x549   :  { %v2720_v31 = vadd.f32 %v2719_v25, %v2529_v28  ;;  %v2721_v33 = vpop.f32.mrb[37].mxu0  ;;  %v2761_v0 = vadd.f32 %v2760_v46, %v2537_v14  ;;  %v2762_v22 = vpop.f32.mrb[37].mxu1 }
 0x54a   :  { %v2722_v52 = vadd.f32 %v2721_v33, %v2533_v17  ;;  %v2723_v34 = vpop.f32.mrb[38].mxu0  ;;  %v2764_v36 = vpop.f32.mrb[38].mxu1  ;;  %v2763_v8 = vadd.f32 %v2762_v22, %v2541_v45 }
 0x54b   :  { %v2769_v47 = vmul.f32 %v2720_v31, %v3944_v58  ;;  %v2771_v10 = vmul.f32 %v2761_v0, %v3973_v21  ;;  %v2724_v50 = vpop.f32.mrb[39].mxu0  ;;  %v2765_v37 = vpop.f32.mrb[39].mxu1 }
 0x54c   :  { %v2770_v12 = vmul.f32 %v2722_v52, %v3956_v4  ;;  %v2772_v40 = vmul.f32 %v2763_v8, %v3976_v23  ;;  %v3126_v4 = vld [vmem:[%s4227_s5 + $0x18] sm:$0xff] }
 0x54d   :  { %v2774_v18 = vadd.f32 %v2773_v55, %v2769_v47  ;;  %v2782_v9 = vmul.f32 %v2769_v47, %v2769_v47  ;;  %v2784_v39 = vmul.f32 %v2771_v10, %v2771_v10 }
 0x54e   :  { %v2783_v29 = vmul.f32 %v2770_v12, %v2770_v12  ;;  %v2785_v58 = vmul.f32 %v2772_v40, %v2772_v40 }
 0x54f   :  { %v2787_v30 = vadd.f32 %v2786_v24, %v2782_v9  ;;  %v2775_v38 = vadd.f32 %v2774_v18, %v2770_v12 }
 0x551   :  { %v2776_v42 = vadd.f32 %v2775_v38, %v2771_v10  ;;  %v2788_v43 = vadd.f32 %v2787_v30, %v2783_v29 }
 0x553   :  { %v2777_v44 = vadd.f32 %v2776_v42, %v2772_v40  ;;  %v2789_v32 = vadd.f32 %v2788_v43, %v2784_v39 }
 0x555   :  { %2778 = vadd.xlane.f32.xlu1 %v2777_v44  ;;  %v2790_v21 = vadd.f32 %v2789_v32, %v2785_v58 }
 0x557   :  { %2791 = vadd.xlane.f32.xlu0 %v2790_v21 }
 0x566   :  { %2823 = vperm.xlu1 %3181, %v3126_v4  }
 0x5e2   :  { %v2779_v35 = vpop.xlane.xlu1 %2778 }
 0x5e3   :  { %v2793_v48 = vmul.f32 0.001953125, %v2779_v35 }
 0x5e4   :  { %v2792_v11 = vpop.xlane.xlu0 %2791 }
 0x5e5   :  { %v2794_v6 = vmul.f32 0.001953125, %v2792_v11  ;;  %v2795_v41 = vmul.f32 %v2793_v48, %v2793_v48  ;;  %v2802_v57 = vsub.f32 %v4189_v5, %v2793_v48  ;;  %v2803_v59 = vsub.f32 %v4191_v13, %v2793_v48 }
 0x5e6   :  { %v2804_v2 = vsub.f32 %v2720_v31, %v2793_v48  ;;  %v2805_v19 = vsub.f32 %v2722_v52, %v2793_v48  ;;  %v2806_v15 = vsub.f32 %v2761_v0, %v2793_v48  ;;  %v2807_v16 = vsub.f32 %v2763_v8, %v2793_v48  ;;  %v2824_v3 = vpop.permute.xlu1 %2823 }
 0x5e7   :  { %v2796_v49 = vsub.f32 %v2794_v6, %v2795_v41 }
 0x5e9   :  { %v2797_v23 = vadd.f32 1e-05, %v2796_v49 }
 0x5eb   :  { %3422 = vrsqrt.f32 %v2797_v23 }
 0x5f5   :  { %v3423_v53 = vpop.eup %3422 }
 0x5f6   :  { %v2801_v54 = vmul.f32 %v3423_v53, %v3125_v51 }
 0x5f8   :  { %2810 = vperm.xlu0 %3182, %v2801_v54  }
 0x677   :  { %v2811_v56 = vpop.permute.xlu0 %2810 }
 0x678   :  { %v2813_v61 = vmul.f32 %v2811_v56, %v2802_v57  ;;  %v2814_v62 = vmul.f32 %v2811_v56, %v2803_v59  ;;  %v2815_v63 = vmul.f32 %v2811_v56, %v2804_v2  ;;  %v2816_v1 = vmul.f32 %v2811_v56, %v2805_v19 }
 0x679   :  { %v2817_v7 = vmul.f32 %v2811_v56, %v2806_v15  ;;  %v2818_v60 = vmul.f32 %v2811_v56, %v2807_v16 }
 0x67a   :  { %v2826_v20 = vadd.f32 %v2824_v3, %v2813_v61  ;;  %v2827_v28 = vadd.f32 %v2824_v3, %v2814_v62  ;;  %v2828_v14 = vadd.f32 %v2824_v3, %v2815_v63  ;;  %v2829_v17 = vadd.f32 %v2824_v3, %v2816_v1 }
 0x67b   :  { %v2830_v45 = vadd.f32 %v2824_v3, %v2817_v7  ;;  %v2831_v5 = vadd.f32 %v2824_v3, %v2818_v60 }
 0x67c   :  { %v3127_v25 = vmul.f32 -1.442695, %v2826_v20  ;;  %v3128_v13 = vmul.f32 -1.442695, %v2827_v28  ;;  %v3129_v46 = vmul.f32 -1.442695, %v2828_v14 }
 0x67d   :  { %v3130_v27 = vmul.f32 -1.442695, %v2829_v17  ;;  %v3131_v26 = vmul.f32 -1.442695, %v2830_v45  ;;  %v3132_v31 = vmul.f32 -1.442695, %v2831_v5 }
 0x67e   :  { %3424 = vpow2.f32 %v3127_v25 }
 0x67f   :  { %3426 = vpow2.f32 %v3128_v13 }
 0x680   :  { %3428 = vpow2.f32 %v3129_v46 }
 0x681   :  { %3430 = vpow2.f32 %v3130_v27 }
 0x682   :  { %3432 = vpow2.f32 %v3131_v26 }
 0x683   :  { %3434 = vpow2.f32 %v3132_v31 }
 0x688   :  { %v3425_v33 = vpop.eup %3424 }
 0x689   :  { %v3427_v0 = vpop.eup %3426  ;;  %v2850_v22 = vadd.f32 1.0, %v3425_v33 }
 0x68a   :  { %v3429_v52 = vpop.eup %3428  ;;  %v2851_v34 = vadd.f32 1.0, %v3427_v0 }
 0x68b   :  { %v3431_v36 = vpop.eup %3430  ;;  %v2852_v55 = vadd.f32 1.0, %v3429_v52  ;;  %3436 = vrcp.f32 %v2850_v22 }
 0x68c   :  { %v3433_v47 = vpop.eup %3432  ;;  %v2853_v10 = vadd.f32 1.0, %v3431_v36  ;;  %3438 = vrcp.f32 %v2851_v34 }
 0x68d   :  { %v3435_v8 = vpop.eup %3434  ;;  %v2854_v50 = vadd.f32 1.0, %v3433_v47  ;;  %3440 = vrcp.f32 %v2852_v55 }
 0x68e   :  { %v2855_v37 = vadd.f32 1.0, %v3435_v8  ;;  %3442 = vrcp.f32 %v2853_v10 }
 0x68f   :  { %3444 = vrcp.f32 %v2854_v50 }
 0x690   :  { %3446 = vrcp.f32 %v2855_v37 }
 0x695   :  { %v3437_v12 = vpop.eup %3436 }
 0x696   :  { %v3439_v24 = vpop.eup %3438  ;;  %v2874_v18 = vrot.slane %v3437_v12, 4 }
 0x697   :  { %v3441_v9 = vpop.eup %3440  ;;  %v2875_v29 = vrot.slane %v3439_v24, 4 }
 0x698   :  { %v3443_v30 = vpop.eup %3442  ;;  %v2876_v38 = vrot.slane %v3441_v9, 4  ;;  %v2886_v39 = vmul.f32 %v2874_v18, %v2826_v20 }
 0x699   :  { %v3445_v40 = vpop.eup %3444  ;;  %v2877_v42 = vrot.slane %v3443_v30, 4  ;;  %v2887_v43 = vmul.f32 %v2875_v29, %v2827_v28 }
 0x69a   :  { %v3447_v44 = vpop.eup %3446  ;;  %v2878_v58 = vrot.slane %v3445_v40, 4  ;;  %v2888_v32 = vmul.f32 %v2876_v38, %v2828_v14 }
 0x69b   :  { %v2879_v21 = vrot.slane %v3447_v44, 4  ;;  %v2889_v4 = vmul.f32 %v2877_v42, %v2829_v17  ;;  %v2898_v35 = vcombine.low %v2886_v39, %v2887_v43 }
 0x69c   :  { %v2890_v48 = vmul.f32 %v2878_v58, %v2830_v45 }
 0x69d   :  { %v2891_v11 = vmul.f32 %v2879_v21, %v2831_v5  ;;  %v2899_v6 = vcombine.low %v2888_v32, %v2889_v4  ;;  %2904 = vst [vmem:[%s4230_s8] sm:$0xff] %v2898_v35 }
 0x69f   :  { %v2900_v41 = vcombine.low %v2890_v48, %v2891_v11  ;;  %2905 = vst [vmem:[%s4230_s8 + $0x8] sm:$0xff] %v2899_v6 }
 0x6a1   :  { %2906 = vst [vmem:[%s4230_s8 + $0x10] sm:$0xff] %v2900_v41 }
 0x6a2   :  { %2911 = vsyncpa [#allocation5], 1 }

</bundles_post_ra>
